<compile_context>
chip_gen: v7x
topology: tpu7x:2x2x1
jax: 0.10.0
libtpu: 0.0.40
codegen_flags: <defaults>
</compile_context>

<pallas_src>
import jax
import jax.numpy as jnp
from jax.experimental import pallas as pl
from jax.experimental.pallas import tpu as pltpu


def _lstm_model_kernel(
    x_ref,        # (T, Bb, I)   time-major batch block of the input
    wih0_ref,     # (I, 4H)      layer-0 input weights (transposed)
    whh0_ref,     # (H, 4H)      layer-0 recurrent weights (transposed)
    b0_ref,       # (1, 4H)      layer-0 bias (b_ih + b_hh)
    w1_ref,       # (2H, 4H)     layer-1 stacked [W_ih^T ; W_hh^T]
    b1_ref,       # (1, 4H)      layer-1 bias (b_ih + b_hh)
    wlin_ref,     # (1, H)       linear weight row
    blin_ref,     # (1, 1)       linear bias
    out_ref,      # (Bb, 1)
):
    T, Bb, I = x_ref.shape
    H = whh0_ref.shape[0]
    G = 4 * H

    # Weights / biases loaded once; VMEM/vreg-resident for the whole recurrence.
    whh0 = whh0_ref[...]
    w1 = w1_ref[...]
    b1 = jnp.broadcast_to(b1_ref[...], (Bb, G))          # hoisted broadcast

    # ---- Layer-0 input projection hoisted out of the time loop. ------------
    # One (T*Bb, I) @ (I, 4H) matmul instead of T tiny matmuls on the serial
    # critical path; bias b0 folded in here as well.
    x2d = x_ref[...].reshape(T * Bb, I)
    xp = jnp.dot(x2d, wih0_ref[...], preferred_element_type=jnp.float32) + b0_ref[...]
    xp = xp.reshape(T, Bb, G)                            # xp[t] is a lane-dense (Bb, 4H) tile

    # Lane mask selecting the g-gate columns [2H, 3H): tanh there, sigmoid elsewhere.
    lanes = jax.lax.broadcasted_iota(jnp.int32, (Bb, G), dimension=1)
    g_mask = jnp.logical_and(lanes >= 2 * H, lanes < 3 * H)

    def gate_combine(gates, c):
        # Whole-vreg EUP passes (1 sigmoid + 1 tanh over the full 128-lane tile)
        # + a lane select, instead of four 32-lane sliced activations.
        act = jnp.where(g_mask, jnp.tanh(gates), jax.nn.sigmoid(gates))
        i_g = act[:, 0 * H:1 * H]
        f_g = act[:, 1 * H:2 * H]
        g_g = act[:, 2 * H:3 * H]
        o_g = act[:, 3 * H:4 * H]
        c_new = f_g * c + i_g * g_g
        h_new = o_g * jnp.tanh(c_new)
        return h_new, c_new

    z = jnp.zeros((Bb, H), jnp.float32)
    h0, c0, h1, c1 = z, z, z, z

    # T is static and small -> fully unroll; every slice below is static and the
    # two recurrent matmuls per step are the only MXU work on the serial chain.
    for t in range(T):
        # layer 0: input part precomputed, single recurrent matmul per step
        gates0 = xp[t] + jnp.dot(h0, whh0, preferred_element_type=jnp.float32)
        h0, c0 = gate_combine(gates0, c0)
        # layer 1: single fused matmul over concat([input h0, recurrent h1])
        hcat = jnp.concatenate([h0, h1], axis=-1)          # (Bb, 2H)
        gates1 = jnp.dot(hcat, w1, preferred_element_type=jnp.float32) + b1
        h1, c1 = gate_combine(gates1, c1)

    # Linear head: (Bb,H)@(H,1) replaced by a VPU multiply + lane reduce.
    wlin = jnp.broadcast_to(wlin_ref[...], (Bb, H))
    out = jnp.sum(h1 * wlin, axis=-1, keepdims=True) + blin_ref[...]
    out_ref[...] = out.astype(out_ref.dtype)


def lstm_model_forward(x, params, *, block_b=None):
    """x: (B, T, n_cilia) float32 -> (B,) float32 (matches PyTorch .flatten())."""
    B, T, I = x.shape

    # Pad batch to a multiple of 8 sublanes (>=8 rows per MXU pass / vreg tile);
    # cap the per-program block at 128 rows so large batches shard across the grid.
    if block_b is None:
        block_b = min(128, 8 * pl.cdiv(B, 8))
    B_pad = block_b * pl.cdiv(B, block_b)
    if B_pad != B:
        x = jnp.pad(x, ((0, B_pad - B), (0, 0), (0, 0)))

    # Time-major layout so the kernel's per-step slice is a leading-dim index
    # (layout plumbing only; done once in the wrapper).
    x_tm = jnp.transpose(x, (1, 0, 2))                     # (T, B_pad, I)

    grid = (B_pad // block_b,)

    def full_spec(a):
        nd = a.ndim
        return pl.BlockSpec(a.shape, lambda i, _nd=nd: (0,) * _nd)

    out = pl.pallas_call(
        _lstm_model_kernel,
        grid=grid,
        in_specs=[
            pl.BlockSpec((T, block_b, I), lambda i: (0, i, 0)),
            full_spec(params["w_ih_l0_t"]),
            full_spec(params["w_hh_l0_t"]),
            full_spec(params["b_l0"]),
            full_spec(params["w_l1_t"]),
            full_spec(params["b_l1"]),
            full_spec(params["w_lin_row"]),
            full_spec(params["b_lin"]),
        ],
        out_specs=pl.BlockSpec((block_b, 1), lambda i: (i, 0)),
        out_shape=jax.ShapeDtypeStruct((B_pad, 1), jnp.float32),
        compiler_params=pltpu.CompilerParams(
            dimension_semantics=("parallel",),   # batch blocks split across cores
        ),
    )(
        x_tm,
        params["w_ih_l0_t"], params["w_hh_l0_t"], params["b_l0"],
        params["w_l1_t"], params["b_l1"],
        params["w_lin_row"], params["b_lin"],
    )
    return out[:B, 0]


def init_params(key, n_cilia, hidden_units):
    """Deterministic init matching PyTorch shapes (uniform(-1/sqrt(H), 1/sqrt(H)))."""
    H = hidden_units
    k = 1.0 / jnp.sqrt(jnp.float32(H))
    keys = jax.random.split(key, 10)

    def u(kk, shape):
        return jax.random.uniform(kk, shape, jnp.float32, minval=-k, maxval=k)

    # PyTorch shapes: weight_ih_l0 (4H, I), weight_hh_l* (4H, H), biases (4H,)
    w_ih_l0 = u(keys[0], (4 * H, n_cilia))
    w_hh_l0 = u(keys[1], (4 * H, H))
    b_ih_l0 = u(keys[2], (4 * H,))
    b_hh_l0 = u(keys[3], (4 * H,))
    w_ih_l1 = u(keys[4], (4 * H, H))
    w_hh_l1 = u(keys[5], (4 * H, H))
    b_ih_l1 = u(keys[6], (4 * H,))
    b_hh_l1 = u(keys[7], (4 * H,))
    # Linear: weight (1, H), bias (1,)
    w_lin = u(keys[8], (1, H))
    b_lin = u(keys[9], (1,))

    return {
        "w_ih_l0_t": w_ih_l0.T,                                      # (I, 4H)
        "w_hh_l0_t": w_hh_l0.T,                                      # (H, 4H)
        "b_l0": (b_ih_l0 + b_hh_l0).reshape(1, -1),                  # (1, 4H)
        "w_l1_t": jnp.concatenate([w_ih_l1.T, w_hh_l1.T], axis=0),   # (2H, 4H) [input; recurrent]
        "b_l1": (b_ih_l1 + b_hh_l1).reshape(1, -1),                  # (1, 4H)
        "w_lin_row": w_lin,                                          # (1, H)
        "b_lin": b_lin.reshape(1, 1),                                # (1, 1)
    }


def _lstm_reference(x, params):
    """Pure-JAX reference with identical eval-mode semantics (for self-check)."""
    B, T, _ = x.shape
    H = params["w_hh_l0_t"].shape[0]
    wih0, whh0 = params["w_ih_l0_t"], params["w_hh_l0_t"]
    w1 = params["w_l1_t"]
    wih1, whh1 = w1[:H], w1[H:]
    b0, b1 = params["b_l0"][0], params["b_l1"][0]

    def cell(xt, h, c, wih, whh, b):
        g = xt @ wih + h @ whh + b
        i = jax.nn.sigmoid(g[:, 0 * H:1 * H])
        f = jax.nn.sigmoid(g[:, 1 * H:2 * H])
        gg = jnp.tanh(g[:, 2 * H:3 * H])
        o = jax.nn.sigmoid(g[:, 3 * H:4 * H])
        c = f * c + i * gg
        return o * jnp.tanh(c), c

    z = jnp.zeros((B, H), jnp.float32)
    h0 = c0 = h1 = c1 = z
    for t in range(T):
        h0, c0 = cell(x[:, t, :], h0, c0, wih0, whh0, b0)
        h1, c1 = cell(h0, h1, c1, wih1, whh1, b1)
    return (h1 @ params["w_lin_row"].T + params["b_lin"]).reshape(-1)


if __name__ == "__main__":
    n_cilia = 4
    hidden_units = 32
    batch = 2
    seq = 8

    key = jax.random.PRNGKey(0)
    k_x, k_p = jax.random.split(key)
    x = jax.random.normal(k_x, (batch, seq, n_cilia), dtype=jnp.float32)
    params = init_params(k_p, n_cilia, hidden_units)

    out = jax.jit(lstm_model_forward)(x, params)
    out = jax.block_until_ready(out)
    assert out.shape == (batch,)

    ref = _lstm_reference(x, params)
    assert jnp.allclose(out, ref, rtol=1e-4, atol=1e-4), (out, ref)

    print("KERNEL_OK")
</pallas_src>

<mosaic_0001>
module attributes {stable_mosaic.version = 11 : i64} {
  func.func @_lstm_model_kernel(%arg0: i32, %arg1: memref<8x8x4xf32, #tpu.memory_space<vmem>>, %arg2: memref<4x128xf32, #tpu.memory_space<vmem>>, %arg3: memref<32x128xf32, #tpu.memory_space<vmem>>, %arg4: memref<1x128xf32, #tpu.memory_space<vmem>>, %arg5: memref<64x128xf32, #tpu.memory_space<vmem>>, %arg6: memref<1x128xf32, #tpu.memory_space<vmem>>, %arg7: memref<1x32xf32, #tpu.memory_space<vmem>>, %arg8: memref<1x1xf32, #tpu.memory_space<vmem>>, %arg9: memref<8x1xf32, #tpu.memory_space<vmem>>) attributes {dimension_semantics = [#tpu.dimension_semantics<parallel>], iteration_bounds = array<i64: 1>, scalar_prefetch = 0 : i64, scratch_operands = 0 : i64, tpu.core_type = #tpu.core_type<tc>, window_params = [{transform_indices = @transform_0, window_bounds = array<i64: 8, 8, 4>}, {pipeline_mode = #tpu.pipeline_mode<synchronous>, transform_indices = @transform_1, window_bounds = array<i64: 4, 128>}, {pipeline_mode = #tpu.pipeline_mode<synchronous>, transform_indices = @transform_2, window_bounds = array<i64: 32, 128>}, {pipeline_mode = #tpu.pipeline_mode<synchronous>, transform_indices = @transform_3, window_bounds = array<i64: 1, 128>}, {pipeline_mode = #tpu.pipeline_mode<synchronous>, transform_indices = @transform_4, window_bounds = array<i64: 64, 128>}, {pipeline_mode = #tpu.pipeline_mode<synchronous>, transform_indices = @transform_5, window_bounds = array<i64: 1, 128>}, {pipeline_mode = #tpu.pipeline_mode<synchronous>, transform_indices = @transform_6, window_bounds = array<i64: 1, 32>}, {pipeline_mode = #tpu.pipeline_mode<synchronous>, transform_indices = @transform_7, window_bounds = array<i64: 1, 1>}, {transform_indices = @transform_8, window_bounds = array<i64: 8, 1>}]} {
    %c0 = arith.constant 0 : index
    %c0_0 = arith.constant 0 : index
    %0 = vector.load %arg3[%c0, %c0_0] : memref<32x128xf32, #tpu.memory_space<vmem>>, vector<32x128xf32>
    %c0_1 = arith.constant 0 : index
    %c0_2 = arith.constant 0 : index
    %1 = vector.load %arg5[%c0_1, %c0_2] : memref<64x128xf32, #tpu.memory_space<vmem>>, vector<64x128xf32>
    %c0_3 = arith.constant 0 : index
    %c0_4 = arith.constant 0 : index
    %2 = vector.load %arg6[%c0_3, %c0_4] : memref<1x128xf32, #tpu.memory_space<vmem>>, vector<1x128xf32>
    %3 = vector.shape_cast %2 : vector<1x128xf32> to vector<1x128xf32>
    %4 = vector.broadcast %3 : vector<1x128xf32> to vector<8x128xf32>
    %c0_5 = arith.constant 0 : index
    %c0_6 = arith.constant 0 : index
    %c0_7 = arith.constant 0 : index
    %5 = vector.load %arg1[%c0_5, %c0_6, %c0_7] : memref<8x8x4xf32, #tpu.memory_space<vmem>>, vector<8x8x4xf32>
    %6 = vector.shape_cast %5 : vector<8x8x4xf32> to vector<64x4xf32>
    %c0_8 = arith.constant 0 : index
    %c0_9 = arith.constant 0 : index
    %7 = vector.load %arg2[%c0_8, %c0_9] : memref<4x128xf32, #tpu.memory_space<vmem>>, vector<4x128xf32>
    %cst = arith.constant dense<0.000000e+00> : vector<64x128xf32>
    %8 = tpu.matmul %6, %7, %cst {dimension_numbers = #tpu.dot_dimension_numbers<[1], [0], [0], [1], [0, 0, 1, 1], [], []>} : vector<64x4xf32>, vector<4x128xf32>, vector<64x128xf32> -> vector<64x128xf32>
    %c0_10 = arith.constant 0 : index
    %c0_11 = arith.constant 0 : index
    %9 = vector.load %arg4[%c0_10, %c0_11] : memref<1x128xf32, #tpu.memory_space<vmem>>, vector<1x128xf32>
    %10 = vector.broadcast %9 : vector<1x128xf32> to vector<64x128xf32>
    %11 = arith.addf %8, %10 : vector<64x128xf32>
    %12 = vector.shape_cast %11 : vector<64x128xf32> to vector<8x8x128xf32>
    %13 = tpu.iota {dimensions = array<i32: 1>} : vector<8x128xi32>
    %c64_i32 = arith.constant 64 : i32
    %14 = vector.broadcast %c64_i32 : i32 to vector<8x128xi32>
    %15 = arith.cmpi sge, %13, %14 : vector<8x128xi32>
    %c96_i32 = arith.constant 96 : i32
    %16 = vector.broadcast %c96_i32 : i32 to vector<8x128xi32>
    %17 = arith.cmpi slt, %13, %16 : vector<8x128xi32>
    %18 = arith.andi %15, %17 : vector<8x128xi1>
    %cst_12 = arith.constant 0.000000e+00 : f32
    %19 = vector.broadcast %cst_12 : f32 to vector<8x32xf32>
    %20 = vector.extract_strided_slice %12 {offsets = [0, 0, 0], sizes = [1, 8, 128], strides = [1, 1, 1]} : vector<8x8x128xf32> to vector<1x8x128xf32>
    %21 = vector.shape_cast %20 : vector<1x8x128xf32> to vector<8x128xf32>
    %cst_13 = arith.constant dense<0.000000e+00> : vector<8x128xf32>
    %22 = tpu.matmul %19, %0, %cst_13 {dimension_numbers = #tpu.dot_dimension_numbers<[1], [0], [0], [1], [0, 0, 1, 1], [], []>} : vector<8x32xf32>, vector<32x128xf32>, vector<8x128xf32> -> vector<8x128xf32>
    %23 = arith.addf %21, %22 : vector<8x128xf32>
    %24 = math.tanh %23 : vector<8x128xf32>
    %25 = arith.negf %23 : vector<8x128xf32>
    %26 = math.exp %25 : vector<8x128xf32>
    %cst_14 = arith.constant 1.000000e+00 : f32
    %27 = vector.broadcast %cst_14 : f32 to vector<8x128xf32>
    %28 = arith.addf %27, %26 : vector<8x128xf32>
    %29 = arith.divf %27, %28 : vector<8x128xf32>
    %30 = arith.select %18, %24, %29 : vector<8x128xi1>, vector<8x128xf32>
    %31 = vector.extract_strided_slice %30 {offsets = [0, 0], sizes = [8, 32], strides = [1, 1]} : vector<8x128xf32> to vector<8x32xf32>
    %32 = vector.extract_strided_slice %30 {offsets = [0, 32], sizes = [8, 32], strides = [1, 1]} : vector<8x128xf32> to vector<8x32xf32>
    %33 = vector.extract_strided_slice %30 {offsets = [0, 64], sizes = [8, 32], strides = [1, 1]} : vector<8x128xf32> to vector<8x32xf32>
    %34 = vector.extract_strided_slice %30 {offsets = [0, 96], sizes = [8, 32], strides = [1, 1]} : vector<8x128xf32> to vector<8x32xf32>
    %35 = arith.mulf %32, %19 : vector<8x32xf32>
    %36 = arith.mulf %31, %33 : vector<8x32xf32>
    %37 = arith.addf %35, %36 : vector<8x32xf32>
    %38 = math.tanh %37 : vector<8x32xf32>
    %39 = arith.mulf %34, %38 : vector<8x32xf32>
    %40 = tpu.concatenate %39, %19 in 1 : vector<8x32xf32>, vector<8x32xf32> -> vector<8x64xf32>
    %cst_15 = arith.constant dense<0.000000e+00> : vector<8x128xf32>
    %41 = tpu.matmul %40, %1, %cst_15 {dimension_numbers = #tpu.dot_dimension_numbers<[1], [0], [0], [1], [0, 0, 1, 1], [], []>} : vector<8x64xf32>, vector<64x128xf32>, vector<8x128xf32> -> vector<8x128xf32>
    %42 = arith.addf %41, %4 : vector<8x128xf32>
    %43 = math.tanh %42 : vector<8x128xf32>
    %44 = arith.negf %42 : vector<8x128xf32>
    %45 = math.exp %44 : vector<8x128xf32>
    %cst_16 = arith.constant 1.000000e+00 : f32
    %46 = vector.broadcast %cst_16 : f32 to vector<8x128xf32>
    %47 = arith.addf %46, %45 : vector<8x128xf32>
    %48 = arith.divf %46, %47 : vector<8x128xf32>
    %49 = arith.select %18, %43, %48 : vector<8x128xi1>, vector<8x128xf32>
    %50 = vector.extract_strided_slice %49 {offsets = [0, 0], sizes = [8, 32], strides = [1, 1]} : vector<8x128xf32> to vector<8x32xf32>
    %51 = vector.extract_strided_slice %49 {offsets = [0, 32], sizes = [8, 32], strides = [1, 1]} : vector<8x128xf32> to vector<8x32xf32>
    %52 = vector.extract_strided_slice %49 {offsets = [0, 64], sizes = [8, 32], strides = [1, 1]} : vector<8x128xf32> to vector<8x32xf32>
    %53 = vector.extract_strided_slice %49 {offsets = [0, 96], sizes = [8, 32], strides = [1, 1]} : vector<8x128xf32> to vector<8x32xf32>
    %54 = arith.mulf %51, %19 : vector<8x32xf32>
    %55 = arith.mulf %50, %52 : vector<8x32xf32>
    %56 = arith.addf %54, %55 : vector<8x32xf32>
    %57 = math.tanh %56 : vector<8x32xf32>
    %58 = arith.mulf %53, %57 : vector<8x32xf32>
    %59 = vector.extract_strided_slice %12 {offsets = [1, 0, 0], sizes = [1, 8, 128], strides = [1, 1, 1]} : vector<8x8x128xf32> to vector<1x8x128xf32>
    %60 = vector.shape_cast %59 : vector<1x8x128xf32> to vector<8x128xf32>
    %cst_17 = arith.constant dense<0.000000e+00> : vector<8x128xf32>
    %61 = tpu.matmul %39, %0, %cst_17 {dimension_numbers = #tpu.dot_dimension_numbers<[1], [0], [0], [1], [0, 0, 1, 1], [], []>} : vector<8x32xf32>, vector<32x128xf32>, vector<8x128xf32> -> vector<8x128xf32>
    %62 = arith.addf %60, %61 : vector<8x128xf32>
    %63 = math.tanh %62 : vector<8x128xf32>
    %64 = arith.negf %62 : vector<8x128xf32>
    %65 = math.exp %64 : vector<8x128xf32>
    %cst_18 = arith.constant 1.000000e+00 : f32
    %66 = vector.broadcast %cst_18 : f32 to vector<8x128xf32>
    %67 = arith.addf %66, %65 : vector<8x128xf32>
    %68 = arith.divf %66, %67 : vector<8x128xf32>
    %69 = arith.select %18, %63, %68 : vector<8x128xi1>, vector<8x128xf32>
    %70 = vector.extract_strided_slice %69 {offsets = [0, 0], sizes = [8, 32], strides = [1, 1]} : vector<8x128xf32> to vector<8x32xf32>
    %71 = vector.extract_strided_slice %69 {offsets = [0, 32], sizes = [8, 32], strides = [1, 1]} : vector<8x128xf32> to vector<8x32xf32>
    %72 = vector.extract_strided_slice %69 {offsets = [0, 64], sizes = [8, 32], strides = [1, 1]} : vector<8x128xf32> to vector<8x32xf32>
    %73 = vector.extract_strided_slice %69 {offsets = [0, 96], sizes = [8, 32], strides = [1, 1]} : vector<8x128xf32> to vector<8x32xf32>
    %74 = arith.mulf %71, %37 : vector<8x32xf32>
    %75 = arith.mulf %70, %72 : vector<8x32xf32>
    %76 = arith.addf %74, %75 : vector<8x32xf32>
    %77 = math.tanh %76 : vector<8x32xf32>
    %78 = arith.mulf %73, %77 : vector<8x32xf32>
    %79 = tpu.concatenate %78, %58 in 1 : vector<8x32xf32>, vector<8x32xf32> -> vector<8x64xf32>
    %cst_19 = arith.constant dense<0.000000e+00> : vector<8x128xf32>
    %80 = tpu.matmul %79, %1, %cst_19 {dimension_numbers = #tpu.dot_dimension_numbers<[1], [0], [0], [1], [0, 0, 1, 1], [], []>} : vector<8x64xf32>, vector<64x128xf32>, vector<8x128xf32> -> vector<8x128xf32>
    %81 = arith.addf %80, %4 : vector<8x128xf32>
    %82 = math.tanh %81 : vector<8x128xf32>
    %83 = arith.negf %81 : vector<8x128xf32>
    %84 = math.exp %83 : vector<8x128xf32>
    %cst_20 = arith.constant 1.000000e+00 : f32
    %85 = vector.broadcast %cst_20 : f32 to vector<8x128xf32>
    %86 = arith.addf %85, %84 : vector<8x128xf32>
    %87 = arith.divf %85, %86 : vector<8x128xf32>
    %88 = arith.select %18, %82, %87 : vector<8x128xi1>, vector<8x128xf32>
    %89 = vector.extract_strided_slice %88 {offsets = [0, 0], sizes = [8, 32], strides = [1, 1]} : vector<8x128xf32> to vector<8x32xf32>
    %90 = vector.extract_strided_slice %88 {offsets = [0, 32], sizes = [8, 32], strides = [1, 1]} : vector<8x128xf32> to vector<8x32xf32>
    %91 = vector.extract_strided_slice %88 {offsets = [0, 64], sizes = [8, 32], strides = [1, 1]} : vector<8x128xf32> to vector<8x32xf32>
    %92 = vector.extract_strided_slice %88 {offsets = [0, 96], sizes = [8, 32], strides = [1, 1]} : vector<8x128xf32> to vector<8x32xf32>
    %93 = arith.mulf %90, %56 : vector<8x32xf32>
    %94 = arith.mulf %89, %91 : vector<8x32xf32>
    %95 = arith.addf %93, %94 : vector<8x32xf32>
    %96 = math.tanh %95 : vector<8x32xf32>
    %97 = arith.mulf %92, %96 : vector<8x32xf32>
    %98 = vector.extract_strided_slice %12 {offsets = [2, 0, 0], sizes = [1, 8, 128], strides = [1, 1, 1]} : vector<8x8x128xf32> to vector<1x8x128xf32>
    %99 = vector.shape_cast %98 : vector<1x8x128xf32> to vector<8x128xf32>
    %cst_21 = arith.constant dense<0.000000e+00> : vector<8x128xf32>
    %100 = tpu.matmul %78, %0, %cst_21 {dimension_numbers = #tpu.dot_dimension_numbers<[1], [0], [0], [1], [0, 0, 1, 1], [], []>} : vector<8x32xf32>, vector<32x128xf32>, vector<8x128xf32> -> vector<8x128xf32>
    %101 = arith.addf %99, %100 : vector<8x128xf32>
    %102 = math.tanh %101 : vector<8x128xf32>
    %103 = arith.negf %101 : vector<8x128xf32>
    %104 = math.exp %103 : vector<8x128xf32>
    %cst_22 = arith.constant 1.000000e+00 : f32
    %105 = vector.broadcast %cst_22 : f32 to vector<8x128xf32>
    %106 = arith.addf %105, %104 : vector<8x128xf32>
    %107 = arith.divf %105, %106 : vector<8x128xf32>
    %108 = arith.select %18, %102, %107 : vector<8x128xi1>, vector<8x128xf32>
    %109 = vector.extract_strided_slice %108 {offsets = [0, 0], sizes = [8, 32], strides = [1, 1]} : vector<8x128xf32> to vector<8x32xf32>
    %110 = vector.extract_strided_slice %108 {offsets = [0, 32], sizes = [8, 32], strides = [1, 1]} : vector<8x128xf32> to vector<8x32xf32>
    %111 = vector.extract_strided_slice %108 {offsets = [0, 64], sizes = [8, 32], strides = [1, 1]} : vector<8x128xf32> to vector<8x32xf32>
    %112 = vector.extract_strided_slice %108 {offsets = [0, 96], sizes = [8, 32], strides = [1, 1]} : vector<8x128xf32> to vector<8x32xf32>
    %113 = arith.mulf %110, %76 : vector<8x32xf32>
    %114 = arith.mulf %109, %111 : vector<8x32xf32>
    %115 = arith.addf %113, %114 : vector<8x32xf32>
    %116 = math.tanh %115 : vector<8x32xf32>
    %117 = arith.mulf %112, %116 : vector<8x32xf32>
    %118 = tpu.concatenate %117, %97 in 1 : vector<8x32xf32>, vector<8x32xf32> -> vector<8x64xf32>
    %cst_23 = arith.constant dense<0.000000e+00> : vector<8x128xf32>
    %119 = tpu.matmul %118, %1, %cst_23 {dimension_numbers = #tpu.dot_dimension_numbers<[1], [0], [0], [1], [0, 0, 1, 1], [], []>} : vector<8x64xf32>, vector<64x128xf32>, vector<8x128xf32> -> vector<8x128xf32>
    %120 = arith.addf %119, %4 : vector<8x128xf32>
    %121 = math.tanh %120 : vector<8x128xf32>
    %122 = arith.negf %120 : vector<8x128xf32>
    %123 = math.exp %122 : vector<8x128xf32>
    %cst_24 = arith.constant 1.000000e+00 : f32
    %124 = vector.broadcast %cst_24 : f32 to vector<8x128xf32>
    %125 = arith.addf %124, %123 : vector<8x128xf32>
    %126 = arith.divf %124, %125 : vector<8x128xf32>
    %127 = arith.select %18, %121, %126 : vector<8x128xi1>, vector<8x128xf32>
    %128 = vector.extract_strided_slice %127 {offsets = [0, 0], sizes = [8, 32], strides = [1, 1]} : vector<8x128xf32> to vector<8x32xf32>
    %129 = vector.extract_strided_slice %127 {offsets = [0, 32], sizes = [8, 32], strides = [1, 1]} : vector<8x128xf32> to vector<8x32xf32>
    %130 = vector.extract_strided_slice %127 {offsets = [0, 64], sizes = [8, 32], strides = [1, 1]} : vector<8x128xf32> to vector<8x32xf32>
    %131 = vector.extract_strided_slice %127 {offsets = [0, 96], sizes = [8, 32], strides = [1, 1]} : vector<8x128xf32> to vector<8x32xf32>
    %132 = arith.mulf %129, %95 : vector<8x32xf32>
    %133 = arith.mulf %128, %130 : vector<8x32xf32>
    %134 = arith.addf %132, %133 : vector<8x32xf32>
    %135 = math.tanh %134 : vector<8x32xf32>
    %136 = arith.mulf %131, %135 : vector<8x32xf32>
    %137 = vector.extract_strided_slice %12 {offsets = [3, 0, 0], sizes = [1, 8, 128], strides = [1, 1, 1]} : vector<8x8x128xf32> to vector<1x8x128xf32>
    %138 = vector.shape_cast %137 : vector<1x8x128xf32> to vector<8x128xf32>
    %cst_25 = arith.constant dense<0.000000e+00> : vector<8x128xf32>
    %139 = tpu.matmul %117, %0, %cst_25 {dimension_numbers = #tpu.dot_dimension_numbers<[1], [0], [0], [1], [0, 0, 1, 1], [], []>} : vector<8x32xf32>, vector<32x128xf32>, vector<8x128xf32> -> vector<8x128xf32>
    %140 = arith.addf %138, %139 : vector<8x128xf32>
    %141 = math.tanh %140 : vector<8x128xf32>
    %142 = arith.negf %140 : vector<8x128xf32>
    %143 = math.exp %142 : vector<8x128xf32>
    %cst_26 = arith.constant 1.000000e+00 : f32
    %144 = vector.broadcast %cst_26 : f32 to vector<8x128xf32>
    %145 = arith.addf %144, %143 : vector<8x128xf32>
    %146 = arith.divf %144, %145 : vector<8x128xf32>
    %147 = arith.select %18, %141, %146 : vector<8x128xi1>, vector<8x128xf32>
    %148 = vector.extract_strided_slice %147 {offsets = [0, 0], sizes = [8, 32], strides = [1, 1]} : vector<8x128xf32> to vector<8x32xf32>
    %149 = vector.extract_strided_slice %147 {offsets = [0, 32], sizes = [8, 32], strides = [1, 1]} : vector<8x128xf32> to vector<8x32xf32>
    %150 = vector.extract_strided_slice %147 {offsets = [0, 64], sizes = [8, 32], strides = [1, 1]} : vector<8x128xf32> to vector<8x32xf32>
    %151 = vector.extract_strided_slice %147 {offsets = [0, 96], sizes = [8, 32], strides = [1, 1]} : vector<8x128xf32> to vector<8x32xf32>
    %152 = arith.mulf %149, %115 : vector<8x32xf32>
    %153 = arith.mulf %148, %150 : vector<8x32xf32>
    %154 = arith.addf %152, %153 : vector<8x32xf32>
    %155 = math.tanh %154 : vector<8x32xf32>
    %156 = arith.mulf %151, %155 : vector<8x32xf32>
    %157 = tpu.concatenate %156, %136 in 1 : vector<8x32xf32>, vector<8x32xf32> -> vector<8x64xf32>
    %cst_27 = arith.constant dense<0.000000e+00> : vector<8x128xf32>
    %158 = tpu.matmul %157, %1, %cst_27 {dimension_numbers = #tpu.dot_dimension_numbers<[1], [0], [0], [1], [0, 0, 1, 1], [], []>} : vector<8x64xf32>, vector<64x128xf32>, vector<8x128xf32> -> vector<8x128xf32>
    %159 = arith.addf %158, %4 : vector<8x128xf32>
    %160 = math.tanh %159 : vector<8x128xf32>
    %161 = arith.negf %159 : vector<8x128xf32>
    %162 = math.exp %161 : vector<8x128xf32>
    %cst_28 = arith.constant 1.000000e+00 : f32
    %163 = vector.broadcast %cst_28 : f32 to vector<8x128xf32>
    %164 = arith.addf %163, %162 : vector<8x128xf32>
    %165 = arith.divf %163, %164 : vector<8x128xf32>
    %166 = arith.select %18, %160, %165 : vector<8x128xi1>, vector<8x128xf32>
    %167 = vector.extract_strided_slice %166 {offsets = [0, 0], sizes = [8, 32], strides = [1, 1]} : vector<8x128xf32> to vector<8x32xf32>
    %168 = vector.extract_strided_slice %166 {offsets = [0, 32], sizes = [8, 32], strides = [1, 1]} : vector<8x128xf32> to vector<8x32xf32>
    %169 = vector.extract_strided_slice %166 {offsets = [0, 64], sizes = [8, 32], strides = [1, 1]} : vector<8x128xf32> to vector<8x32xf32>
    %170 = vector.extract_strided_slice %166 {offsets = [0, 96], sizes = [8, 32], strides = [1, 1]} : vector<8x128xf32> to vector<8x32xf32>
    %171 = arith.mulf %168, %134 : vector<8x32xf32>
    %172 = arith.mulf %167, %169 : vector<8x32xf32>
    %173 = arith.addf %171, %172 : vector<8x32xf32>
    %174 = math.tanh %173 : vector<8x32xf32>
    %175 = arith.mulf %170, %174 : vector<8x32xf32>
    %176 = vector.extract_strided_slice %12 {offsets = [4, 0, 0], sizes = [1, 8, 128], strides = [1, 1, 1]} : vector<8x8x128xf32> to vector<1x8x128xf32>
    %177 = vector.shape_cast %176 : vector<1x8x128xf32> to vector<8x128xf32>
    %cst_29 = arith.constant dense<0.000000e+00> : vector<8x128xf32>
    %178 = tpu.matmul %156, %0, %cst_29 {dimension_numbers = #tpu.dot_dimension_numbers<[1], [0], [0], [1], [0, 0, 1, 1], [], []>} : vector<8x32xf32>, vector<32x128xf32>, vector<8x128xf32> -> vector<8x128xf32>
    %179 = arith.addf %177, %178 : vector<8x128xf32>
    %180 = math.tanh %179 : vector<8x128xf32>
    %181 = arith.negf %179 : vector<8x128xf32>
    %182 = math.exp %181 : vector<8x128xf32>
    %cst_30 = arith.constant 1.000000e+00 : f32
    %183 = vector.broadcast %cst_30 : f32 to vector<8x128xf32>
    %184 = arith.addf %183, %182 : vector<8x128xf32>
    %185 = arith.divf %183, %184 : vector<8x128xf32>
    %186 = arith.select %18, %180, %185 : vector<8x128xi1>, vector<8x128xf32>
    %187 = vector.extract_strided_slice %186 {offsets = [0, 0], sizes = [8, 32], strides = [1, 1]} : vector<8x128xf32> to vector<8x32xf32>
    %188 = vector.extract_strided_slice %186 {offsets = [0, 32], sizes = [8, 32], strides = [1, 1]} : vector<8x128xf32> to vector<8x32xf32>
    %189 = vector.extract_strided_slice %186 {offsets = [0, 64], sizes = [8, 32], strides = [1, 1]} : vector<8x128xf32> to vector<8x32xf32>
    %190 = vector.extract_strided_slice %186 {offsets = [0, 96], sizes = [8, 32], strides = [1, 1]} : vector<8x128xf32> to vector<8x32xf32>
    %191 = arith.mulf %188, %154 : vector<8x32xf32>
    %192 = arith.mulf %187, %189 : vector<8x32xf32>
    %193 = arith.addf %191, %192 : vector<8x32xf32>
    %194 = math.tanh %193 : vector<8x32xf32>
    %195 = arith.mulf %190, %194 : vector<8x32xf32>
    %196 = tpu.concatenate %195, %175 in 1 : vector<8x32xf32>, vector<8x32xf32> -> vector<8x64xf32>
    %cst_31 = arith.constant dense<0.000000e+00> : vector<8x128xf32>
    %197 = tpu.matmul %196, %1, %cst_31 {dimension_numbers = #tpu.dot_dimension_numbers<[1], [0], [0], [1], [0, 0, 1, 1], [], []>} : vector<8x64xf32>, vector<64x128xf32>, vector<8x128xf32> -> vector<8x128xf32>
    %198 = arith.addf %197, %4 : vector<8x128xf32>
    %199 = math.tanh %198 : vector<8x128xf32>
    %200 = arith.negf %198 : vector<8x128xf32>
    %201 = math.exp %200 : vector<8x128xf32>
    %cst_32 = arith.constant 1.000000e+00 : f32
    %202 = vector.broadcast %cst_32 : f32 to vector<8x128xf32>
    %203 = arith.addf %202, %201 : vector<8x128xf32>
    %204 = arith.divf %202, %203 : vector<8x128xf32>
    %205 = arith.select %18, %199, %204 : vector<8x128xi1>, vector<8x128xf32>
    %206 = vector.extract_strided_slice %205 {offsets = [0, 0], sizes = [8, 32], strides = [1, 1]} : vector<8x128xf32> to vector<8x32xf32>
    %207 = vector.extract_strided_slice %205 {offsets = [0, 32], sizes = [8, 32], strides = [1, 1]} : vector<8x128xf32> to vector<8x32xf32>
    %208 = vector.extract_strided_slice %205 {offsets = [0, 64], sizes = [8, 32], strides = [1, 1]} : vector<8x128xf32> to vector<8x32xf32>
    %209 = vector.extract_strided_slice %205 {offsets = [0, 96], sizes = [8, 32], strides = [1, 1]} : vector<8x128xf32> to vector<8x32xf32>
    %210 = arith.mulf %207, %173 : vector<8x32xf32>
    %211 = arith.mulf %206, %208 : vector<8x32xf32>
    %212 = arith.addf %210, %211 : vector<8x32xf32>
    %213 = math.tanh %212 : vector<8x32xf32>
    %214 = arith.mulf %209, %213 : vector<8x32xf32>
    %215 = vector.extract_strided_slice %12 {offsets = [5, 0, 0], sizes = [1, 8, 128], strides = [1, 1, 1]} : vector<8x8x128xf32> to vector<1x8x128xf32>
    %216 = vector.shape_cast %215 : vector<1x8x128xf32> to vector<8x128xf32>
    %cst_33 = arith.constant dense<0.000000e+00> : vector<8x128xf32>
    %217 = tpu.matmul %195, %0, %cst_33 {dimension_numbers = #tpu.dot_dimension_numbers<[1], [0], [0], [1], [0, 0, 1, 1], [], []>} : vector<8x32xf32>, vector<32x128xf32>, vector<8x128xf32> -> vector<8x128xf32>
    %218 = arith.addf %216, %217 : vector<8x128xf32>
    %219 = math.tanh %218 : vector<8x128xf32>
    %220 = arith.negf %218 : vector<8x128xf32>
    %221 = math.exp %220 : vector<8x128xf32>
    %cst_34 = arith.constant 1.000000e+00 : f32
    %222 = vector.broadcast %cst_34 : f32 to vector<8x128xf32>
    %223 = arith.addf %222, %221 : vector<8x128xf32>
    %224 = arith.divf %222, %223 : vector<8x128xf32>
    %225 = arith.select %18, %219, %224 : vector<8x128xi1>, vector<8x128xf32>
    %226 = vector.extract_strided_slice %225 {offsets = [0, 0], sizes = [8, 32], strides = [1, 1]} : vector<8x128xf32> to vector<8x32xf32>
    %227 = vector.extract_strided_slice %225 {offsets = [0, 32], sizes = [8, 32], strides = [1, 1]} : vector<8x128xf32> to vector<8x32xf32>
    %228 = vector.extract_strided_slice %225 {offsets = [0, 64], sizes = [8, 32], strides = [1, 1]} : vector<8x128xf32> to vector<8x32xf32>
    %229 = vector.extract_strided_slice %225 {offsets = [0, 96], sizes = [8, 32], strides = [1, 1]} : vector<8x128xf32> to vector<8x32xf32>
    %230 = arith.mulf %227, %193 : vector<8x32xf32>
    %231 = arith.mulf %226, %228 : vector<8x32xf32>
    %232 = arith.addf %230, %231 : vector<8x32xf32>
    %233 = math.tanh %232 : vector<8x32xf32>
    %234 = arith.mulf %229, %233 : vector<8x32xf32>
    %235 = tpu.concatenate %234, %214 in 1 : vector<8x32xf32>, vector<8x32xf32> -> vector<8x64xf32>
    %cst_35 = arith.constant dense<0.000000e+00> : vector<8x128xf32>
    %236 = tpu.matmul %235, %1, %cst_35 {dimension_numbers = #tpu.dot_dimension_numbers<[1], [0], [0], [1], [0, 0, 1, 1], [], []>} : vector<8x64xf32>, vector<64x128xf32>, vector<8x128xf32> -> vector<8x128xf32>
    %237 = arith.addf %236, %4 : vector<8x128xf32>
    %238 = math.tanh %237 : vector<8x128xf32>
    %239 = arith.negf %237 : vector<8x128xf32>
    %240 = math.exp %239 : vector<8x128xf32>
    %cst_36 = arith.constant 1.000000e+00 : f32
    %241 = vector.broadcast %cst_36 : f32 to vector<8x128xf32>
    %242 = arith.addf %241, %240 : vector<8x128xf32>
    %243 = arith.divf %241, %242 : vector<8x128xf32>
    %244 = arith.select %18, %238, %243 : vector<8x128xi1>, vector<8x128xf32>
    %245 = vector.extract_strided_slice %244 {offsets = [0, 0], sizes = [8, 32], strides = [1, 1]} : vector<8x128xf32> to vector<8x32xf32>
    %246 = vector.extract_strided_slice %244 {offsets = [0, 32], sizes = [8, 32], strides = [1, 1]} : vector<8x128xf32> to vector<8x32xf32>
    %247 = vector.extract_strided_slice %244 {offsets = [0, 64], sizes = [8, 32], strides = [1, 1]} : vector<8x128xf32> to vector<8x32xf32>
    %248 = vector.extract_strided_slice %244 {offsets = [0, 96], sizes = [8, 32], strides = [1, 1]} : vector<8x128xf32> to vector<8x32xf32>
    %249 = arith.mulf %246, %212 : vector<8x32xf32>
    %250 = arith.mulf %245, %247 : vector<8x32xf32>
    %251 = arith.addf %249, %250 : vector<8x32xf32>
    %252 = math.tanh %251 : vector<8x32xf32>
    %253 = arith.mulf %248, %252 : vector<8x32xf32>
    %254 = vector.extract_strided_slice %12 {offsets = [6, 0, 0], sizes = [1, 8, 128], strides = [1, 1, 1]} : vector<8x8x128xf32> to vector<1x8x128xf32>
    %255 = vector.shape_cast %254 : vector<1x8x128xf32> to vector<8x128xf32>
    %cst_37 = arith.constant dense<0.000000e+00> : vector<8x128xf32>
    %256 = tpu.matmul %234, %0, %cst_37 {dimension_numbers = #tpu.dot_dimension_numbers<[1], [0], [0], [1], [0, 0, 1, 1], [], []>} : vector<8x32xf32>, vector<32x128xf32>, vector<8x128xf32> -> vector<8x128xf32>
    %257 = arith.addf %255, %256 : vector<8x128xf32>
    %258 = math.tanh %257 : vector<8x128xf32>
    %259 = arith.negf %257 : vector<8x128xf32>
    %260 = math.exp %259 : vector<8x128xf32>
    %cst_38 = arith.constant 1.000000e+00 : f32
    %261 = vector.broadcast %cst_38 : f32 to vector<8x128xf32>
    %262 = arith.addf %261, %260 : vector<8x128xf32>
    %263 = arith.divf %261, %262 : vector<8x128xf32>
    %264 = arith.select %18, %258, %263 : vector<8x128xi1>, vector<8x128xf32>
    %265 = vector.extract_strided_slice %264 {offsets = [0, 0], sizes = [8, 32], strides = [1, 1]} : vector<8x128xf32> to vector<8x32xf32>
    %266 = vector.extract_strided_slice %264 {offsets = [0, 32], sizes = [8, 32], strides = [1, 1]} : vector<8x128xf32> to vector<8x32xf32>
    %267 = vector.extract_strided_slice %264 {offsets = [0, 64], sizes = [8, 32], strides = [1, 1]} : vector<8x128xf32> to vector<8x32xf32>
    %268 = vector.extract_strided_slice %264 {offsets = [0, 96], sizes = [8, 32], strides = [1, 1]} : vector<8x128xf32> to vector<8x32xf32>
    %269 = arith.mulf %266, %232 : vector<8x32xf32>
    %270 = arith.mulf %265, %267 : vector<8x32xf32>
    %271 = arith.addf %269, %270 : vector<8x32xf32>
    %272 = math.tanh %271 : vector<8x32xf32>
    %273 = arith.mulf %268, %272 : vector<8x32xf32>
    %274 = tpu.concatenate %273, %253 in 1 : vector<8x32xf32>, vector<8x32xf32> -> vector<8x64xf32>
    %cst_39 = arith.constant dense<0.000000e+00> : vector<8x128xf32>
    %275 = tpu.matmul %274, %1, %cst_39 {dimension_numbers = #tpu.dot_dimension_numbers<[1], [0], [0], [1], [0, 0, 1, 1], [], []>} : vector<8x64xf32>, vector<64x128xf32>, vector<8x128xf32> -> vector<8x128xf32>
    %276 = arith.addf %275, %4 : vector<8x128xf32>
    %277 = math.tanh %276 : vector<8x128xf32>
    %278 = arith.negf %276 : vector<8x128xf32>
    %279 = math.exp %278 : vector<8x128xf32>
    %cst_40 = arith.constant 1.000000e+00 : f32
    %280 = vector.broadcast %cst_40 : f32 to vector<8x128xf32>
    %281 = arith.addf %280, %279 : vector<8x128xf32>
    %282 = arith.divf %280, %281 : vector<8x128xf32>
    %283 = arith.select %18, %277, %282 : vector<8x128xi1>, vector<8x128xf32>
    %284 = vector.extract_strided_slice %283 {offsets = [0, 0], sizes = [8, 32], strides = [1, 1]} : vector<8x128xf32> to vector<8x32xf32>
    %285 = vector.extract_strided_slice %283 {offsets = [0, 32], sizes = [8, 32], strides = [1, 1]} : vector<8x128xf32> to vector<8x32xf32>
    %286 = vector.extract_strided_slice %283 {offsets = [0, 64], sizes = [8, 32], strides = [1, 1]} : vector<8x128xf32> to vector<8x32xf32>
    %287 = vector.extract_strided_slice %283 {offsets = [0, 96], sizes = [8, 32], strides = [1, 1]} : vector<8x128xf32> to vector<8x32xf32>
    %288 = arith.mulf %285, %251 : vector<8x32xf32>
    %289 = arith.mulf %284, %286 : vector<8x32xf32>
    %290 = arith.addf %288, %289 : vector<8x32xf32>
    %291 = math.tanh %290 : vector<8x32xf32>
    %292 = arith.mulf %287, %291 : vector<8x32xf32>
    %293 = vector.extract_strided_slice %12 {offsets = [7, 0, 0], sizes = [1, 8, 128], strides = [1, 1, 1]} : vector<8x8x128xf32> to vector<1x8x128xf32>
    %294 = vector.shape_cast %293 : vector<1x8x128xf32> to vector<8x128xf32>
    %cst_41 = arith.constant dense<0.000000e+00> : vector<8x128xf32>
    %295 = tpu.matmul %273, %0, %cst_41 {dimension_numbers = #tpu.dot_dimension_numbers<[1], [0], [0], [1], [0, 0, 1, 1], [], []>} : vector<8x32xf32>, vector<32x128xf32>, vector<8x128xf32> -> vector<8x128xf32>
    %296 = arith.addf %294, %295 : vector<8x128xf32>
    %297 = math.tanh %296 : vector<8x128xf32>
    %298 = arith.negf %296 : vector<8x128xf32>
    %299 = math.exp %298 : vector<8x128xf32>
    %cst_42 = arith.constant 1.000000e+00 : f32
    %300 = vector.broadcast %cst_42 : f32 to vector<8x128xf32>
    %301 = arith.addf %300, %299 : vector<8x128xf32>
    %302 = arith.divf %300, %301 : vector<8x128xf32>
    %303 = arith.select %18, %297, %302 : vector<8x128xi1>, vector<8x128xf32>
    %304 = vector.extract_strided_slice %303 {offsets = [0, 0], sizes = [8, 32], strides = [1, 1]} : vector<8x128xf32> to vector<8x32xf32>
    %305 = vector.extract_strided_slice %303 {offsets = [0, 32], sizes = [8, 32], strides = [1, 1]} : vector<8x128xf32> to vector<8x32xf32>
    %306 = vector.extract_strided_slice %303 {offsets = [0, 64], sizes = [8, 32], strides = [1, 1]} : vector<8x128xf32> to vector<8x32xf32>
    %307 = vector.extract_strided_slice %303 {offsets = [0, 96], sizes = [8, 32], strides = [1, 1]} : vector<8x128xf32> to vector<8x32xf32>
    %308 = arith.mulf %305, %271 : vector<8x32xf32>
    %309 = arith.mulf %304, %306 : vector<8x32xf32>
    %310 = arith.addf %308, %309 : vector<8x32xf32>
    %311 = math.tanh %310 : vector<8x32xf32>
    %312 = arith.mulf %307, %311 : vector<8x32xf32>
    %313 = tpu.concatenate %312, %292 in 1 : vector<8x32xf32>, vector<8x32xf32> -> vector<8x64xf32>
    %cst_43 = arith.constant dense<0.000000e+00> : vector<8x128xf32>
    %314 = tpu.matmul %313, %1, %cst_43 {dimension_numbers = #tpu.dot_dimension_numbers<[1], [0], [0], [1], [0, 0, 1, 1], [], []>} : vector<8x64xf32>, vector<64x128xf32>, vector<8x128xf32> -> vector<8x128xf32>
    %315 = arith.addf %314, %4 : vector<8x128xf32>
    %316 = math.tanh %315 : vector<8x128xf32>
    %317 = arith.negf %315 : vector<8x128xf32>
    %318 = math.exp %317 : vector<8x128xf32>
    %cst_44 = arith.constant 1.000000e+00 : f32
    %319 = vector.broadcast %cst_44 : f32 to vector<8x128xf32>
    %320 = arith.addf %319, %318 : vector<8x128xf32>
    %321 = arith.divf %319, %320 : vector<8x128xf32>
    %322 = arith.select %18, %316, %321 : vector<8x128xi1>, vector<8x128xf32>
    %323 = vector.extract_strided_slice %322 {offsets = [0, 0], sizes = [8, 32], strides = [1, 1]} : vector<8x128xf32> to vector<8x32xf32>
    %324 = vector.extract_strided_slice %322 {offsets = [0, 32], sizes = [8, 32], strides = [1, 1]} : vector<8x128xf32> to vector<8x32xf32>
    %325 = vector.extract_strided_slice %322 {offsets = [0, 64], sizes = [8, 32], strides = [1, 1]} : vector<8x128xf32> to vector<8x32xf32>
    %326 = vector.extract_strided_slice %322 {offsets = [0, 96], sizes = [8, 32], strides = [1, 1]} : vector<8x128xf32> to vector<8x32xf32>
    %327 = arith.mulf %324, %290 : vector<8x32xf32>
    %328 = arith.mulf %323, %325 : vector<8x32xf32>
    %329 = arith.addf %327, %328 : vector<8x32xf32>
    %330 = math.tanh %329 : vector<8x32xf32>
    %331 = arith.mulf %326, %330 : vector<8x32xf32>
    %c0_45 = arith.constant 0 : index
    %c0_46 = arith.constant 0 : index
    %332 = vector.load %arg7[%c0_45, %c0_46] : memref<1x32xf32, #tpu.memory_space<vmem>>, vector<1x32xf32>
    %333 = vector.shape_cast %332 : vector<1x32xf32> to vector<1x32xf32>
    %334 = vector.broadcast %333 : vector<1x32xf32> to vector<8x32xf32>
    %335 = arith.mulf %331, %334 : vector<8x32xf32>
    %cst_47 = arith.constant dense<0.000000e+00> : vector<8xf32>
    %336 = vector.multi_reduction <add>, %335, %cst_47 [1] : vector<8x32xf32> to vector<8xf32>
    %337 = vector.shape_cast %336 : vector<8xf32> to vector<8x1xf32>
    %c0_48 = arith.constant 0 : index
    %c0_49 = arith.constant 0 : index
    %338 = vector.load %arg8[%c0_48, %c0_49] : memref<1x1xf32, #tpu.memory_space<vmem>>, vector<1x1xf32>
    %339 = vector.broadcast %338 : vector<1x1xf32> to vector<8x1xf32>
    %340 = arith.addf %337, %339 : vector<8x1xf32>
    %c0_50 = arith.constant 0 : index
    %c0_51 = arith.constant 0 : index
    %341 = vector.load %arg9[%c0_50, %c0_51] : memref<8x1xf32, #tpu.memory_space<vmem>>, vector<8x1xf32>
    tpu.vector_store %arg9[%c0_50, %c0_51], %340 {strides = array<i32>} : memref<8x1xf32, #tpu.memory_space<vmem>>, vector<8x1xf32>,
    return
  }
  func.func @transform_0(%arg0: i32) -> (i32, i32, i32) {
    %c0_i32 = arith.constant 0 : i32
    %c0_i32_0 = arith.constant 0 : i32
    %c0_i32_1 = arith.constant 0 : i32
    return %c0_i32, %arg0, %c0_i32_0 : i32, i32, i32
  }
  func.func @transform_1(%arg0: i32) -> (i32, i32) {
    %c0_i32 = arith.constant 0 : i32
    %c0_i32_0 = arith.constant 0 : i32
    %c0_i32_1 = arith.constant 0 : i32
    return %c0_i32, %c0_i32_0 : i32, i32
  }
  func.func @transform_2(%arg0: i32) -> (i32, i32) {
    %c0_i32 = arith.constant 0 : i32
    %c0_i32_0 = arith.constant 0 : i32
    %c0_i32_1 = arith.constant 0 : i32
    return %c0_i32, %c0_i32_0 : i32, i32
  }
  func.func @transform_3(%arg0: i32) -> (i32, i32) {
    %c0_i32 = arith.constant 0 : i32
    %c0_i32_0 = arith.constant 0 : i32
    %c0_i32_1 = arith.constant 0 : i32
    return %c0_i32, %c0_i32_0 : i32, i32
  }
  func.func @transform_4(%arg0: i32) -> (i32, i32) {
    %c0_i32 = arith.constant 0 : i32
    %c0_i32_0 = arith.constant 0 : i32
    %c0_i32_1 = arith.constant 0 : i32
    return %c0_i32, %c0_i32_0 : i32, i32
  }
  func.func @transform_5(%arg0: i32) -> (i32, i32) {
    %c0_i32 = arith.constant 0 : i32
    %c0_i32_0 = arith.constant 0 : i32
    %c0_i32_1 = arith.constant 0 : i32
    return %c0_i32, %c0_i32_0 : i32, i32
  }
  func.func @transform_6(%arg0: i32) -> (i32, i32) {
    %c0_i32 = arith.constant 0 : i32
    %c0_i32_0 = arith.constant 0 : i32
    %c0_i32_1 = arith.constant 0 : i32
    return %c0_i32, %c0_i32_0 : i32, i32
  }
  func.func @transform_7(%arg0: i32) -> (i32, i32) {
    %c0_i32 = arith.constant 0 : i32
    %c0_i32_0 = arith.constant 0 : i32
    %c0_i32_1 = arith.constant 0 : i32
    return %c0_i32, %c0_i32_0 : i32, i32
  }
  func.func @transform_8(%arg0: i32) -> (i32, i32) {
    %c0_i32 = arith.constant 0 : i32
    %c0_i32_0 = arith.constant 0 : i32
    return %arg0, %c0_i32 : i32, i32
  }
}

</mosaic_0001>

<bundles_post_ra>
// kernel: lstm_model_forward.1
= control target key start
LH: loop header
LB: loop body
LE: loop exit
PB: predicated region body
PF: predicated region fallthrough
CT: control target
= control target key end

     0   :  { %vm91_vm0 = vcmask 1043456   ;;  %vm66_vm1 = vcmask 31744   ;;  %v2573_v0 = vmov 0.0|0.0   ;;  %vm2574_vm2 = vmmov 0   ;;  %s2576_s19 = smov 64   ;;  %s2577_s20 = smov 32   ;;  %s3072_s2 = inlined_call_operand.vmem [shape: f32[32,128], index: 2, kind: input, shape index: {}]   ;;  %s3073_s1 = inlined_call_operand.vmem [shape: f32[4,128], index: 1, kind: input, shape index: {}]   ;;  %s3074_s0 = inlined_call_operand.vmem [shape: f32[8,8,4], index: 0, kind: input, shape index: {}]   ;;  %s3075_s3 = inlined_call_operand.vmem [shape: f32[1,128], index: 3, kind: input, shape index: {}]   ;;  %s3076_s4 = inlined_call_operand.vmem [shape: f32[64,128], index: 4, kind: input, shape index: {}]   ;;  %s3077_s5 = inlined_call_operand.vmem [shape: f32[1,128], index: 5, kind: input, shape index: {}]   ;;  %s3078_s6 = inlined_call_operand.vmem [shape: f32[1,32], index: 6, kind: input, shape index: {}]   ;;  %s3079_s7 = inlined_call_operand.<no memory space> [shape: f32[1,1], index: 7, kind: input, shape index: {}]   ;;  %s3080_s8 = inlined_call_operand.vmem [shape: f32[8,1], index: 8, kind: output, shape index: {}]  }
   0x1   :  { %2294 = vmatprep.subr.bf16.mxu1 %v2573_v0  ;;  %v31_v1 = vld [vmem:[%s3072_s2] sm:$0xff]  ;;  %v32_v2 = vld [vmem:[%s3072_s2 + $0x8] sm:$0xff]  ;;  %v33_v7 = vld [vmem:[%s3072_s2 + $0x10] sm:$0xff]  ;;  %v2575_v8 = vmov 0.0   ;;  %v200_v20 = vlaneseq  ;;  %vm205_vm6 = vcmask 261120   ;;  %vm310_vm7 = vcmask 523264  }
   0x2   :  { %v58_v3 = vld [vmem:[%s3073_s1] sm:$0xf]  ;;  %v2634_v4 = vpack.c.bf16 %v32_v2, %v31_v1  ;;  %v51_v6 = vld [vmem:[%s3074_s0 + $0x8] sm:$0xff]  ;;  %2062 = vmatprep.mubr.msk.f32.mxu1 %vm2574_vm2, %v2575_v8  ;;  %v34_v9 = vld [vmem:[%s3072_s2 + $0x18] sm:$0xff]  ;;  %s2578_s29 = smov 96   ;;  %v13_v23 = vstv %s3079_s7  ;;  %vm1869_vm8 = vcmask 7168  }
   0x3   :  { %2040 = vmatprep.subr.msk.mxu0 %vm91_vm0, %v58_v3  ;;  %v50_v5 = vld [vmem:[%s3074_s0] sm:$0xff]  ;;  %v2655_v10 = vpack.c.bf16 %v34_v9, %v33_v7  ;;  %v201_v22 = vand.u32 127, %v200_v20  ;;  %v52_v32 = vld [vmem:[%s3074_s0 + $0x10] sm:$0xff]  ;;  %v53_v33 = vld [vmem:[%s3074_s0 + $0x18] sm:$0xff]  ;;  %14 = vst [vmem:[#allocation2] sm:$0x1] %v13_v23 }
   0x4   :  { %2041 = vmatpush3.msk.msra.mxu0 %vm91_vm0, %v58_v3  ;;  %2042 = vmatprep.mubr.msk.f32.mxu0 %vm66_vm1, %v50_v5  ;;  %v2669_v12 = vld [vmem:[%s3075_s3] ss:$0 sm:$0xff]  ;;  %v36_v36 = vld [vmem:[%s3076_s4 + $0x8] sm:$0xff]  ;;  %v37_v37 = vld [vmem:[%s3076_s4 + $0x10] sm:$0xff] }
   0x5   :  { %2296 = vmatpush3.bf16.msra.mxu1 %v2634_v4  ;;  %2043 = vmatmul.mubr.msk.f32.vlgmr.msra.gmra.mrb[0].mxu0 %vm66_vm1, %v51_v6  ;;  %vm202_vm3 = vcmp.ge.s32.totalorder %v201_v22, 64  ;;  %vm203_vm4 = vcmp.lt.s32.totalorder %v201_v22, 96  ;;  %v54_v34 = vld [vmem:[%s3074_s0 + $0x20] sm:$0xff]  ;;  %v38_v39 = vld [vmem:[%s3076_s4 + $0x18] sm:$0xff]  ;;  %v55_v40 = vld [vmem:[%s3074_s0 + $0x28] sm:$0xff] }
   0x6   :  { %2297 = vmatprep.subr.bf16.mxu1 %v2573_v0  ;;  %2300 = vmatprep.subr.bf16.mxu0 %v2573_v0  ;;  %vm2672_vm5 = vmand %vm202_vm3, %vm203_vm4  ;;  %v35_v35 = vld [vmem:[%s3076_s4] sm:$0xff]  ;;  %v2713_v41 = vpack.c.bf16 %v38_v39, %v37_v37  ;;  %v56_v42 = vld [vmem:[%s3074_s0 + $0x30] sm:$0xff] }
   0x7   :  { %2045 = vmatprep.mubr.msk.f32.mxu0 %vm66_vm1, %v52_v32  ;;  %v2702_v38 = vpack.c.bf16 %v36_v36, %v35_v35  ;;  %v39_v43 = vld [vmem:[%s3076_s4 + $0x20] sm:$0xff]  ;;  %v40_v44 = vld [vmem:[%s3076_s4 + $0x28] sm:$0xff]  ;;  %v57_v45 = vld [vmem:[%s3074_s0 + $0x38] sm:$0xff] }
   0x8   :  { %v2733_v46 = vpack.c.bf16 %v40_v44, %v39_v43  ;;  %v41_v47 = vld [vmem:[%s3076_s4 + $0x30] sm:$0xff]  ;;  %v42_v48 = vld [vmem:[%s3076_s4 + $0x38] sm:$0xff]  ;;  %v2789_v61 = vld [vmem:[%s3077_s5] ss:$0 sm:$0xff] }
   0x9   :  { %2299 = vmatpush3.bf16.msra.mxu1 %v2655_v10  ;;  %2046 = vmatmul.mubr.msk.f32.gmra.mrb[2].mxu0 %vm66_vm1, %v53_v33  ;;  %v2749_v50 = vpack.c.bf16 %v42_v48, %v41_v47 }
   0xa   :  { %2318 = vmatprep.subr.bf16.mxu1 %v2573_v0  ;;  %2048 = vmatprep.mubr.msk.f32.mxu0 %vm66_vm1, %v54_v34 }
   0xb   :  { %2302 = vmatpush3.bf16.msra.mxu0 %v2702_v38 }
   0xc   :  { %2063 = vmatmul.mubr.f32.vlgmr.msra.gmra.mrb[0].mxu1 %v2575_v8  ;;  %2303 = vmatprep.subr.bf16.mxu0 %v2573_v0 }
   0xd   :  { %2111 = vmatprep.mubr.msk.f32.mxu1 %vm2574_vm2, %v2575_v8  ;;  %2320 = vmatpush3.bf16.msra.mxu1 %v2702_v38 }
   0xe   :  { %2321 = vmatprep.subr.bf16.mxu1 %v2573_v0  ;;  %2049 = vmatmul.mubr.msk.f32.gmra.mrb[4].mxu0 %vm66_vm1, %v55_v40 }
   0xf   :  { %2051 = vmatprep.mubr.msk.f32.mxu0 %vm66_vm1, %v56_v42  ;;  %2305 = vmatpush3.bf16.msra.mxu0 %v2713_v41 }
  0x10   :  { %2306 = vmatprep.subr.bf16.mxu0 %v2573_v0 }
  0x11   :  { %2323 = vmatpush3.bf16.msra.mxu1 %v2713_v41 }
  0x12   :  { %2324 = vmatprep.subr.bf16.mxu1 %v2573_v0  ;;  %2052 = vmatmul.mubr.msk.f32.gmra.mrb[6].mxu0 %vm66_vm1, %v57_v45 }
  0x13   :  { %2081 = vmatprep.mubr.msk.f32.mxu0 %vm2574_vm2, %v2575_v8  ;;  %2308 = vmatpush3.bf16.msra.mxu0 %v2733_v46 }
  0x14   :  { %2309 = vmatprep.subr.bf16.mxu0 %v2573_v0 }
  0x15   :  { %2326 = vmatpush3.bf16.msra.mxu1 %v2733_v46 }
  0x16   :  { %2327 = vmatprep.subr.bf16.mxu1 %v2573_v0 }
  0x17   :  { %2311 = vmatpush3.bf16.msra.mxu0 %v2749_v50 }
  0x18   :  { %2312 = vmatprep.subr.bf16.mxu0 %v2573_v0 }
  0x19   :  { %2329 = vmatpush3.bf16.msra.mxu1 %v2749_v50 }
  0x1a   :  { %2348 = vmatprep.subr.bf16.mxu1 %v2573_v0 }
  0xd8   :  { %v2664_v11 = vpop.f32.mrb[0].mxu0 }
  0xd9   :  { %v161_v13 = vpop.f32.mrb[1].mxu0  ;;  %v167_v3 = vadd.f32 %v2664_v11, %v2669_v12 }
  0xda   :  { %v162_v14 = vadd.f32 %v2669_v12, %v161_v13 }
  0xdc   :  { %v2759_v53 = vpop.f32.mrb[2].mxu0 }
  0xdd   :  { %v2761_v54 = vpop.f32.mrb[3].mxu0 }
  0xde   :  { %v172_v44 = vadd.f32 %v2669_v12, %v2761_v54 }
  0xdf   :  { %v275_v15 = vpop.f32.mrb[0].mxu1 }
  0xe0   :  { %v279_v16 = vadd.f32 %v275_v15, %v162_v14  ;;  %v2064_v17 = vpop.f32.mrb[1].mxu1 }
  0xe1   :  { %v2763_v55 = vpop.f32.mrb[4].mxu0 }
  0xe2   :  { %v1886_v18 = vmul.f32 -1.442695, %v279_v16  ;;  %v2765_v56 = vpop.f32.mrb[5].mxu0 }
  0xe4   :  { %2444 = vpow2.f32 %v1886_v18 }
  0xe5   :  { %2446 = vtanh.f32 %v279_v16  ;;  %v2767_v57 = vpop.f32.mrb[6].mxu0 }
  0xe6   :  { %v2769_v58 = vpop.f32.mrb[7].mxu0 }
  0xee   :  { %v2445_v19 = vpop.eup %2444 }
  0xef   :  { %v284_v21 = vadd.f32 1.0, %v2445_v19  ;;  %v2447_v24 = vpop.eup %2446 }
  0xf1   :  { %2448 = vrcp.f32 %v284_v21 }
  0xfb   :  { %v2449_v25 = vpop.eup %2448 }
  0xfc   :  { %v287_v26 = vsel %vm2672_vm5, %v2447_v24, %v2449_v25 }
  0xfd   :  { %290 = vrot.lane.b32.xlu0 %v287_v26, %s2576_s19  ;;  %v288_v29 = vmul.f32 0.0, %v287_v26 }
 0x16f   :  { %v291_v27 = vpop.permute.xlu0 %290 }
 0x170   :  { %v293_v28 = vmul.f32 %v291_v27, %v287_v26 }
 0x172   :  { %295 = vrot.lane.b32.xlu0 %v293_v28, %s2577_s20 }
 0x1e4   :  { %v296_v30 = vpop.permute.xlu0 %295 }
 0x1e5   :  { %v2680_v31 = vadd.f32 %v296_v30, %v288_v29 }
 0x1e7   :  { %2450 = vtanh.f32 %v2680_v31 }
 0x1f1   :  { %v2451_v49 = vpop.eup %2450 }
 0x1f2   :  { %301 = vrot.lane.b32.xlu1 %v2451_v49, %s2576_s19 }
 0x264   :  { %v302_v51 = vpop.permute.xlu1 %301 }
 0x265   :  { %v304_v52 = vmul.f32 %v302_v51, %v287_v26 }
 0x267   :  { %306 = vrot.lane.b32.xlu1 %v304_v52, %s2577_s20 }
 0x2d9   :  { %v307_v59 = vpop.permute.xlu1 %306 }
 0x2da   :  { %v309_v60 = vsel %vm205_vm6, %v307_v59, 0.0 }
 0x2db   :  { %2082 = vmatmul.mubr.msk.f32.vlgmr.msra.gmra.mrb[8].mxu0 %vm310_vm7, %v309_v60 }
 0x2dc   :  { %2314 = vmatpush3.bf16.msra.mxu0 %v2634_v4  ;;  %2092 = vmatprep.mubr.msk.f32.mxu0 %vm2574_vm2, %v2575_v8 }
 0x2dd   :  { %2315 = vmatprep.subr.bf16.mxu0 %v2573_v0 }
 0x2e0   :  { %2317 = vmatpush3.bf16.msra.mxu0 %v2655_v10 }
 0x2e1   :  { %2330 = vmatprep.subr.bf16.mxu0 %v2573_v0 }
 0x2e3   :  { %2093 = vmatmul.mubr.msk.f32.vlgmr.msra.gmra.mrb[10].mxu0 %vm205_vm6, %v307_v59 }
 0x2e4   :  { %2332 = vmatpush3.bf16.msra.mxu0 %v2634_v4  ;;  %2122 = vmatprep.mubr.msk.f32.mxu0 %vm2574_vm2, %v2575_v8 }
 0x2e5   :  { %2333 = vmatprep.subr.bf16.mxu0 %v2573_v0 }
 0x2e8   :  { %2335 = vmatpush3.bf16.msra.mxu0 %v2655_v10 }
 0x2e9   :  { %2336 = vmatprep.subr.bf16.mxu0 %v2573_v0 }
 0x3ae   :  { %v380_v62 = vpop.f32.mrb[8].mxu0 }
 0x3af   :  { %v381_v63 = vadd.f32 %v2789_v61, %v380_v62  ;;  %v2083_v1 = vpop.f32.mrb[9].mxu0 }
 0x3b1   :  { %v1888_v2 = vmul.f32 -1.442695, %v381_v63 }
 0x3b3   :  { %2452 = vpow2.f32 %v1888_v2 }
 0x3b6   :  { %v477_v5 = vpop.f32.mrb[10].mxu0 }
 0x3b7   :  { %v481_v6 = vadd.f32 %v477_v5, %v167_v3  ;;  %v2094_v7 = vpop.f32.mrb[11].mxu0 }
 0x3b9   :  { %v1890_v9 = vmul.f32 -1.442695, %v481_v6 }
 0x3bb   :  { %2454 = vpow2.f32 %v1890_v9 }
 0x3bc   :  { %2456 = vtanh.f32 %v381_v63 }
 0x3bd   :  { %v2453_v13 = vpop.eup %2452 }
 0x3be   :  { %v388_v14 = vadd.f32 1.0, %v2453_v13 }
 0x3c0   :  { %2458 = vrcp.f32 %v388_v14 }
 0x3c1   :  { %2460 = vtanh.f32 %v481_v6 }
 0x3c5   :  { %v2455_v15 = vpop.eup %2454 }
 0x3c6   :  { %v486_v16 = vadd.f32 1.0, %v2455_v15  ;;  %v2457_v17 = vpop.eup %2456 }
 0x3c8   :  { %2462 = vrcp.f32 %v486_v16 }
 0x3ca   :  { %v2459_v18 = vpop.eup %2458 }
 0x3cb   :  { %v391_v19 = vsel %vm2672_vm5, %v2457_v17, %v2459_v18  ;;  %v2461_v11 = vpop.eup %2460 }
 0x3cc   :  { %394 = vrot.lane.b32.xlu0 %v391_v19, %s2576_s19  ;;  %v392_v27 = vmul.f32 0.0, %v391_v19 }
 0x3d2   :  { %v2463_v20 = vpop.eup %2462 }
 0x3d3   :  { %v489_v21 = vsel %vm2672_vm5, %v2461_v11, %v2463_v20 }
 0x3d4   :  { %492 = vrot.lane.b32.xlu1 %v489_v21, %s2576_s19  ;;  %v490_v30 = vmul.f32 %v489_v21, %v2680_v31 }
 0x43e   :  { %v395_v22 = vpop.permute.xlu0 %394 }
 0x43f   :  { %v397_v24 = vmul.f32 %v395_v22, %v391_v19 }
 0x441   :  { %399 = vrot.lane.b32.xlu0 %v397_v24, %s2577_s20 }
 0x446   :  { %v493_v25 = vpop.permute.xlu1 %492 }
 0x447   :  { %v495_v26 = vmul.f32 %v493_v25, %v489_v21 }
 0x449   :  { %497 = vrot.lane.b32.xlu1 %v495_v26, %s2577_s20 }
 0x4b3   :  { %v400_v28 = vpop.permute.xlu0 %399 }
 0x4b4   :  { %v2802_v29 = vadd.f32 %v400_v28, %v392_v27 }
 0x4b6   :  { %2464 = vtanh.f32 %v2802_v29 }
 0x4bb   :  { %v498_v32 = vpop.permute.xlu1 %497 }
 0x4bc   :  { %v2806_v33 = vadd.f32 %v498_v32, %v490_v30 }
 0x4be   :  { %2466 = vtanh.f32 %v2806_v33 }
 0x4c0   :  { %v2465_v34 = vpop.eup %2464 }
 0x4c1   :  { %405 = vrot.lane.b32.xlu0 %v2465_v34, %s2576_s19 }
 0x4c8   :  { %v2467_v35 = vpop.eup %2466 }
 0x4c9   :  { %503 = vrot.lane.b32.xlu1 %v2467_v35, %s2576_s19 }
 0x533   :  { %v406_v36 = vpop.permute.xlu0 %405 }
 0x534   :  { %v408_v37 = vmul.f32 %v406_v36, %v391_v19 }
 0x536   :  { %512 = vrot.lane.b32.xlu1 %v408_v37, %s2576_s19 }
 0x53b   :  { %v504_v39 = vpop.permute.xlu1 %503 }
 0x53c   :  { %v506_v40 = vmul.f32 %v504_v39, %v489_v21 }
 0x53e   :  { %508 = vrot.lane.b32.xlu0 %v506_v40, %s2577_s20 }
 0x5a8   :  { %v513_v31 = vpop.permute.xlu1 %512 }
 0x5b0   :  { %v509_v42 = vpop.permute.xlu0 %508 }
 0x5b1   :  { %v515_v43 = vsel %vm205_vm6, %v509_v42, %v513_v31  ;;  %2123 = vmatmul.mubr.msk.f32.vlgmr.msra.gmra.mrb[12].mxu0 %vm205_vm6, %v509_v42 }
 0x5b2   :  { %2112 = vmatmul.mubr.msk.f32.vlgmr.msra.gmra.mrb[2].mxu1 %vm310_vm7, %v515_v43  ;;  %2338 = vmatpush3.bf16.msra.mxu0 %v2702_v38 }
 0x5b3   :  { %2339 = vmatprep.subr.bf16.mxu0 %v2573_v0  ;;  %2350 = vmatpush3.bf16.msra.mxu1 %v2634_v4 }
 0x5b4   :  { %2351 = vmatprep.subr.bf16.mxu1 %v2573_v0  ;;  %2152 = vmatprep.mubr.msk.f32.mxu1 %vm2574_vm2, %v2575_v8 }
 0x5b5   :  { %2141 = vmatprep.mubr.msk.f32.mxu0 %vm2574_vm2, %v2575_v8 }
 0x5b6   :  { %2341 = vmatpush3.bf16.msra.mxu0 %v2713_v41 }
 0x5b7   :  { %2342 = vmatprep.subr.bf16.mxu0 %v2573_v0  ;;  %2353 = vmatpush3.bf16.msra.mxu1 %v2655_v10 }
 0x5b8   :  { %2354 = vmatprep.subr.bf16.mxu1 %v2573_v0 }
 0x5ba   :  { %2344 = vmatpush3.bf16.msra.mxu0 %v2733_v46 }
 0x5bb   :  { %2345 = vmatprep.subr.bf16.mxu0 %v2573_v0 }
 0x5be   :  { %2347 = vmatpush3.bf16.msra.mxu0 %v2749_v50 }
 0x5bf   :  { %2366 = vmatprep.subr.bf16.mxu0 %v2573_v0 }
 0x684   :  { %v682_v45 = vpop.f32.mrb[12].mxu0 }
 0x685   :  { %v686_v47 = vadd.f32 %v682_v45, %v172_v44  ;;  %v585_v48 = vpop.f32.mrb[2].mxu1  ;;  %v2124_v49 = vpop.f32.mrb[13].mxu0 }
 0x686   :  { %v586_v51 = vadd.f32 %v2789_v61, %v585_v48  ;;  %v2113_v52 = vpop.f32.mrb[3].mxu1 }
 0x687   :  { %v1894_v59 = vmul.f32 -1.442695, %v686_v47 }
 0x688   :  { %v1892_v60 = vmul.f32 -1.442695, %v586_v51 }
 0x689   :  { %2468 = vpow2.f32 %v1894_v59 }
 0x68a   :  { %2470 = vpow2.f32 %v1892_v60 }
 0x68b   :  { %2472 = vtanh.f32 %v686_v47 }
 0x68c   :  { %2474 = vtanh.f32 %v586_v51 }
 0x693   :  { %v2469_v62 = vpop.eup %2468 }
 0x694   :  { %v2471_v63 = vpop.eup %2470  ;;  %v691_v1 = vadd.f32 1.0, %v2469_v62 }
 0x695   :  { %v593_v2 = vadd.f32 1.0, %v2471_v63  ;;  %v2473_v54 = vpop.eup %2472 }
 0x696   :  { %2476 = vrcp.f32 %v691_v1  ;;  %v2475_v3 = vpop.eup %2474 }
 0x697   :  { %2478 = vrcp.f32 %v593_v2 }
 0x6a0   :  { %v2477_v5 = vpop.eup %2476 }
 0x6a1   :  { %v2479_v6 = vpop.eup %2478  ;;  %v694_v7 = vsel %vm2672_vm5, %v2473_v54, %v2477_v5 }
 0x6a2   :  { %697 = vrot.lane.b32.xlu1 %v694_v7, %s2576_s19  ;;  %v596_v9 = vsel %vm2672_vm5, %v2475_v3, %v2479_v6  ;;  %v695_v17 = vmul.f32 %v694_v7, %v2806_v33  ;;  %v177_v33 = vadd.f32 %v2759_v53, %v2669_v12 }
 0x6a3   :  { %599 = vrot.lane.b32.xlu0 %v596_v9, %s2576_s19  ;;  %v597_v19 = vmul.f32 %v596_v9, %v2802_v29 }
 0x714   :  { %v698_v13 = vpop.permute.xlu1 %697 }
 0x715   :  { %v700_v14 = vmul.f32 %v698_v13, %v694_v7  ;;  %v600_v15 = vpop.permute.xlu0 %599 }
 0x716   :  { %v602_v16 = vmul.f32 %v600_v15, %v596_v9 }
 0x717   :  { %702 = vrot.lane.b32.xlu1 %v700_v14, %s2577_s20 }
 0x718   :  { %604 = vrot.lane.b32.xlu0 %v602_v16, %s2577_s20 }
 0x789   :  { %v703_v18 = vpop.permute.xlu1 %702 }
 0x78a   :  { %v2845_v11 = vadd.f32 %v703_v18, %v695_v17  ;;  %v605_v20 = vpop.permute.xlu0 %604 }
 0x78b   :  { %v2847_v21 = vadd.f32 %v605_v20, %v597_v19  ;;  %v182_v20 = vadd.f32 %v2669_v12, %v2765_v56 }
 0x78c   :  { %2480 = vtanh.f32 %v2845_v11 }
 0x78d   :  { %2482 = vtanh.f32 %v2847_v21 }
 0x796   :  { %v2481_v22 = vpop.eup %2480 }
 0x797   :  { %v2483_v24 = vpop.eup %2482  ;;  %708 = vrot.lane.b32.xlu1 %v2481_v22, %s2576_s19 }
 0x798   :  { %610 = vrot.lane.b32.xlu0 %v2483_v24, %s2576_s19 }
 0x809   :  { %v709_v25 = vpop.permute.xlu1 %708 }
 0x80a   :  { %v711_v26 = vmul.f32 %v709_v25, %v694_v7  ;;  %v611_v27 = vpop.permute.xlu0 %610 }
 0x80b   :  { %v613_v28 = vmul.f32 %v611_v27, %v596_v9 }
 0x80c   :  { %713 = vrot.lane.b32.xlu0 %v711_v26, %s2577_s20 }
 0x80d   :  { %717 = vrot.lane.b32.xlu1 %v613_v28, %s2576_s19 }
 0x87e   :  { %v714_v29 = vpop.permute.xlu0 %713 }
 0x87f   :  { %2153 = vmatmul.mubr.msk.f32.vlgmr.msra.gmra.mrb[4].mxu1 %vm205_vm6, %v714_v29  ;;  %v718_v30 = vpop.permute.xlu1 %717 }
 0x880   :  { %v720_v32 = vsel %vm205_vm6, %v714_v29, %v718_v30  ;;  %2356 = vmatpush3.bf16.msra.mxu1 %v2702_v38  ;;  %2171 = vmatprep.mubr.msk.f32.mxu1 %vm2574_vm2, %v2575_v8 }
 0x881   :  { %2142 = vmatmul.mubr.msk.f32.vlgmr.msra.gmra.mrb[14].mxu0 %vm310_vm7, %v720_v32  ;;  %2357 = vmatprep.subr.bf16.mxu1 %v2573_v0 }
 0x882   :  { %2368 = vmatpush3.bf16.msra.mxu0 %v2634_v4  ;;  %2182 = vmatprep.mubr.msk.f32.mxu0 %vm2574_vm2, %v2575_v8 }
 0x883   :  { %2369 = vmatprep.subr.bf16.mxu0 %v2573_v0 }
 0x884   :  { %2359 = vmatpush3.bf16.msra.mxu1 %v2713_v41 }
 0x885   :  { %2360 = vmatprep.subr.bf16.mxu1 %v2573_v0 }
 0x886   :  { %2371 = vmatpush3.bf16.msra.mxu0 %v2655_v10 }
 0x887   :  { %2372 = vmatprep.subr.bf16.mxu0 %v2573_v0 }
 0x888   :  { %2362 = vmatpush3.bf16.msra.mxu1 %v2733_v46 }
 0x889   :  { %2363 = vmatprep.subr.bf16.mxu1 %v2573_v0 }
 0x88c   :  { %2365 = vmatpush3.bf16.msra.mxu1 %v2749_v50 }
 0x88d   :  { %2384 = vmatprep.subr.bf16.mxu1 %v2573_v0 }
 0x952   :  { %v887_v34 = vpop.f32.mrb[4].mxu1 }
 0x953   :  { %v891_v35 = vadd.f32 %v887_v34, %v177_v33  ;;  %v2154_v36 = vpop.f32.mrb[5].mxu1 }
 0x954   :  { %v790_v37 = vpop.f32.mrb[14].mxu0 }
 0x955   :  { %v1898_v39 = vmul.f32 -1.442695, %v891_v35  ;;  %v791_v40 = vadd.f32 %v2789_v61, %v790_v37  ;;  %v2143_v31 = vpop.f32.mrb[15].mxu0 }
 0x957   :  { %2484 = vpow2.f32 %v1898_v39  ;;  %v1896_v42 = vmul.f32 -1.442695, %v791_v40 }
 0x959   :  { %2486 = vpow2.f32 %v1896_v42 }
 0x95a   :  { %2488 = vtanh.f32 %v891_v35 }
 0x961   :  { %v2485_v43 = vpop.eup %2484 }
 0x962   :  { %v896_v44 = vadd.f32 1.0, %v2485_v43 }
 0x963   :  { %v2487_v45 = vpop.eup %2486 }
 0x964   :  { %2490 = vrcp.f32 %v896_v44  ;;  %v798_v47 = vadd.f32 1.0, %v2487_v45  ;;  %v2489_v53 = vpop.eup %2488 }
 0x965   :  { %2492 = vtanh.f32 %v791_v40 }
 0x966   :  { %2494 = vrcp.f32 %v798_v47 }
 0x96e   :  { %v2491_v48 = vpop.eup %2490 }
 0x96f   :  { %v2493_v49 = vpop.eup %2492  ;;  %v899_v51 = vsel %vm2672_vm5, %v2489_v53, %v2491_v48 }
 0x970   :  { %v2495_v52 = vpop.eup %2494  ;;  %902 = vrot.lane.b32.xlu1 %v899_v51, %s2576_s19  ;;  %v900_v2 = vmul.f32 %v899_v51, %v2845_v11 }
 0x971   :  { %v801_v59 = vsel %vm2672_vm5, %v2493_v49, %v2495_v52 }
 0x972   :  { %804 = vrot.lane.b32.xlu0 %v801_v59, %s2576_s19  ;;  %v802_v5 = vmul.f32 %v801_v59, %v2847_v21 }
 0x9e2   :  { %v903_v60 = vpop.permute.xlu1 %902 }
 0x9e3   :  { %v905_v62 = vmul.f32 %v903_v60, %v899_v51 }
 0x9e4   :  { %v805_v63 = vpop.permute.xlu0 %804 }
 0x9e5   :  { %v807_v1 = vmul.f32 %v805_v63, %v801_v59  ;;  %907 = vrot.lane.b32.xlu1 %v905_v62, %s2577_s20 }
 0x9e7   :  { %809 = vrot.lane.b32.xlu0 %v807_v1, %s2577_s20 }
 0xa57   :  { %v908_v54 = vpop.permute.xlu1 %907 }
 0xa58   :  { %v2886_v3 = vadd.f32 %v908_v54, %v900_v2 }
 0xa59   :  { %v810_v6 = vpop.permute.xlu0 %809 }
 0xa5a   :  { %2496 = vtanh.f32 %v2886_v3  ;;  %v2890_v7 = vadd.f32 %v810_v6, %v802_v5  ;;  %v187_v5 = vadd.f32 %v2763_v55, %v2669_v12 }
 0xa5c   :  { %2498 = vtanh.f32 %v2890_v7 }
 0xa64   :  { %v2497_v9 = vpop.eup %2496 }
 0xa65   :  { %913 = vrot.lane.b32.xlu1 %v2497_v9, %s2576_s19 }
 0xa66   :  { %v2499_v13 = vpop.eup %2498 }
 0xa67   :  { %815 = vrot.lane.b32.xlu0 %v2499_v13, %s2576_s19 }
 0xad7   :  { %v914_v14 = vpop.permute.xlu1 %913 }
 0xad8   :  { %v916_v15 = vmul.f32 %v914_v14, %v899_v51 }
 0xad9   :  { %v816_v16 = vpop.permute.xlu0 %815 }
 0xada   :  { %v818_v17 = vmul.f32 %v816_v16, %v801_v59  ;;  %918 = vrot.lane.b32.xlu0 %v916_v15, %s2577_s20 }
 0xadc   :  { %922 = vrot.lane.b32.xlu1 %v818_v17, %s2576_s19 }
 0xb4c   :  { %v919_v18 = vpop.permute.xlu0 %918 }
 0xb4d   :  { %2183 = vmatmul.mubr.msk.f32.vlgmr.msra.gmra.mrb[16].mxu0 %vm205_vm6, %v919_v18 }
 0xb4e   :  { %v923_v19 = vpop.permute.xlu1 %922  ;;  %2374 = vmatpush3.bf16.msra.mxu0 %v2702_v38  ;;  %2201 = vmatprep.mubr.msk.f32.mxu0 %vm2574_vm2, %v2575_v8 }
 0xb4f   :  { %v925_v11 = vsel %vm205_vm6, %v919_v18, %v923_v19  ;;  %2375 = vmatprep.subr.bf16.mxu0 %v2573_v0 }
 0xb50   :  { %2172 = vmatmul.mubr.msk.f32.vlgmr.msra.gmra.mrb[6].mxu1 %vm310_vm7, %v925_v11 }
 0xb51   :  { %2386 = vmatpush3.bf16.msra.mxu1 %v2634_v4  ;;  %2212 = vmatprep.mubr.msk.f32.mxu1 %vm2574_vm2, %v2575_v8 }
 0xb52   :  { %2377 = vmatpush3.bf16.msra.mxu0 %v2713_v41  ;;  %2387 = vmatprep.subr.bf16.mxu1 %v2573_v0 }
 0xb53   :  { %2378 = vmatprep.subr.bf16.mxu0 %v2573_v0 }
 0xb55   :  { %2389 = vmatpush3.bf16.msra.mxu1 %v2655_v10 }
 0xb56   :  { %2380 = vmatpush3.bf16.msra.mxu0 %v2733_v46  ;;  %2390 = vmatprep.subr.bf16.mxu1 %v2573_v0 }
 0xb57   :  { %2381 = vmatprep.subr.bf16.mxu0 %v2573_v0 }
 0xb5a   :  { %2383 = vmatpush3.bf16.msra.mxu0 %v2749_v50 }
 0xb5b   :  { %2402 = vmatprep.subr.bf16.mxu0 %v2573_v0 }
 0xc20   :  { %v1092_v21 = vpop.f32.mrb[16].mxu0 }
 0xc21   :  { %v1096_v22 = vadd.f32 %v1092_v21, %v182_v20  ;;  %v2184_v24 = vpop.f32.mrb[17].mxu0 }
 0xc23   :  { %v1902_v25 = vmul.f32 -1.442695, %v1096_v22  ;;  %v995_v26 = vpop.f32.mrb[6].mxu1 }
 0xc24   :  { %v996_v27 = vadd.f32 %v2789_v61, %v995_v26  ;;  %v2173_v28 = vpop.f32.mrb[7].mxu1 }
 0xc25   :  { %2500 = vpow2.f32 %v1902_v25 }
 0xc26   :  { %v1900_v29 = vmul.f32 -1.442695, %v996_v27 }
 0xc28   :  { %2502 = vpow2.f32 %v1900_v29 }
 0xc29   :  { %2504 = vtanh.f32 %v1096_v22 }
 0xc2f   :  { %v2501_v30 = vpop.eup %2500 }
 0xc30   :  { %v1101_v32 = vadd.f32 1.0, %v2501_v30 }
 0xc32   :  { %v2503_v33 = vpop.eup %2502  ;;  %2506 = vrcp.f32 %v1101_v32 }
 0xc33   :  { %v1003_v34 = vadd.f32 1.0, %v2503_v33  ;;  %2508 = vtanh.f32 %v996_v27  ;;  %v2505_v56 = vpop.eup %2504 }
 0xc35   :  { %2510 = vrcp.f32 %v1003_v34 }
 0xc3c   :  { %v2507_v35 = vpop.eup %2506 }
 0xc3d   :  { %v1104_v36 = vsel %vm2672_vm5, %v2505_v56, %v2507_v35  ;;  %v2509_v37 = vpop.eup %2508 }
 0xc3e   :  { %1107 = vrot.lane.b32.xlu1 %v1104_v36, %s2576_s19  ;;  %v1105_v45 = vmul.f32 %v1104_v36, %v2886_v3 }
 0xc3f   :  { %v2511_v39 = vpop.eup %2510 }
 0xc40   :  { %v1006_v40 = vsel %vm2672_vm5, %v2509_v37, %v2511_v39 }
 0xc41   :  { %1009 = vrot.lane.b32.xlu0 %v1006_v40, %s2576_s19  ;;  %v1007_v48 = vmul.f32 %v1006_v40, %v2890_v7 }
 0xcb0   :  { %v1108_v31 = vpop.permute.xlu1 %1107 }
 0xcb1   :  { %v1110_v42 = vmul.f32 %v1108_v31, %v1104_v36 }
 0xcb3   :  { %v1010_v43 = vpop.permute.xlu0 %1009  ;;  %1112 = vrot.lane.b32.xlu1 %v1110_v42, %s2577_s20 }
 0xcb4   :  { %v1012_v44 = vmul.f32 %v1010_v43, %v1006_v40 }
 0xcb6   :  { %1014 = vrot.lane.b32.xlu0 %v1012_v44, %s2577_s20 }
 0xd25   :  { %v1113_v47 = vpop.permute.xlu1 %1112 }
 0xd26   :  { %v2928_v53 = vadd.f32 %v1113_v47, %v1105_v45 }
 0xd28   :  { %2512 = vtanh.f32 %v2928_v53  ;;  %v1015_v49 = vpop.permute.xlu0 %1014 }
 0xd29   :  { %v2932_v51 = vadd.f32 %v1015_v49, %v1007_v48 }
 0xd2b   :  { %2514 = vtanh.f32 %v2932_v51 }
 0xd32   :  { %v2513_v52 = vpop.eup %2512 }
 0xd33   :  { %1118 = vrot.lane.b32.xlu1 %v2513_v52, %s2576_s19 }
 0xd35   :  { %v2515_v59 = vpop.eup %2514 }
 0xd36   :  { %1020 = vrot.lane.b32.xlu0 %v2515_v59, %s2576_s19 }
 0xda5   :  { %v1119_v60 = vpop.permute.xlu1 %1118 }
 0xda6   :  { %v1121_v62 = vmul.f32 %v1119_v60, %v1104_v36 }
 0xda8   :  { %v1021_v63 = vpop.permute.xlu0 %1020  ;;  %1123 = vrot.lane.b32.xlu0 %v1121_v62, %s2577_s20 }
 0xda9   :  { %v1023_v1 = vmul.f32 %v1021_v63, %v1006_v40 }
 0xdab   :  { %1127 = vrot.lane.b32.xlu1 %v1023_v1, %s2576_s19 }
 0xe1a   :  { %v1124_v2 = vpop.permute.xlu0 %1123 }
 0xe1b   :  { %2213 = vmatmul.mubr.msk.f32.vlgmr.msra.gmra.mrb[8].mxu1 %vm205_vm6, %v1124_v2 }
 0xe1c   :  { %2392 = vmatpush3.bf16.msra.mxu1 %v2702_v38  ;;  %2231 = vmatprep.mubr.msk.f32.mxu1 %vm2574_vm2, %v2575_v8 }
 0xe1d   :  { %v1128_v54 = vpop.permute.xlu1 %1127  ;;  %2393 = vmatprep.subr.bf16.mxu1 %v2573_v0 }
 0xe1e   :  { %v1130_v3 = vsel %vm205_vm6, %v1124_v2, %v1128_v54 }
 0xe1f   :  { %2202 = vmatmul.mubr.msk.f32.vlgmr.msra.gmra.mrb[18].mxu0 %vm310_vm7, %v1130_v3 }
 0xe20   :  { %2404 = vmatpush3.bf16.msra.mxu0 %v2634_v4  ;;  %2395 = vmatpush3.bf16.msra.mxu1 %v2713_v41 }
 0xe21   :  { %2405 = vmatprep.subr.bf16.mxu0 %v2573_v0  ;;  %2396 = vmatprep.subr.bf16.mxu1 %v2573_v0 }
 0xe22   :  { %2242 = vmatprep.mubr.msk.f32.mxu0 %vm2574_vm2, %v2575_v8 }
 0xe24   :  { %2407 = vmatpush3.bf16.msra.mxu0 %v2655_v10  ;;  %2398 = vmatpush3.bf16.msra.mxu1 %v2733_v46 }
 0xe25   :  { %2399 = vmatprep.subr.bf16.mxu1 %v2573_v0  ;;  %2408 = vmatprep.subr.bf16.mxu0 %v2573_v0 }
 0xe28   :  { %2401 = vmatpush3.bf16.msra.mxu1 %v2749_v50 }
 0xe29   :  { %2420 = vmatprep.subr.bf16.mxu1 %v2573_v0 }
 0xeee   :  { %v1297_v6 = vpop.f32.mrb[8].mxu1 }
 0xeef   :  { %v1301_v7 = vadd.f32 %v1297_v6, %v187_v5  ;;  %v2214_v9 = vpop.f32.mrb[9].mxu1 }
 0xef1   :  { %v1906_v13 = vmul.f32 -1.442695, %v1301_v7 }
 0xef2   :  { %v1200_v14 = vpop.f32.mrb[18].mxu0 }
 0xef3   :  { %2516 = vpow2.f32 %v1906_v13  ;;  %v1201_v15 = vadd.f32 %v2789_v61, %v1200_v14  ;;  %v2203_v16 = vpop.f32.mrb[19].mxu0 }
 0xef5   :  { %v1904_v17 = vmul.f32 -1.442695, %v1201_v15 }
 0xef7   :  { %2518 = vpow2.f32 %v1904_v17 }
 0xef8   :  { %2520 = vtanh.f32 %v1301_v7 }
 0xefd   :  { %v2517_v18 = vpop.eup %2516 }
 0xefe   :  { %v1306_v19 = vadd.f32 1.0, %v2517_v18 }
 0xf00   :  { %2522 = vrcp.f32 %v1306_v19 }
 0xf01   :  { %v2519_v11 = vpop.eup %2518  ;;  %2524 = vtanh.f32 %v1201_v15 }
 0xf02   :  { %v1208_v20 = vadd.f32 1.0, %v2519_v11  ;;  %v2521_v55 = vpop.eup %2520 }
 0xf04   :  { %2526 = vrcp.f32 %v1208_v20 }
 0xf0a   :  { %v2523_v21 = vpop.eup %2522 }
 0xf0b   :  { %v1309_v22 = vsel %vm2672_vm5, %v2521_v55, %v2523_v21  ;;  %v2525_v24 = vpop.eup %2524 }
 0xf0c   :  { %1312 = vrot.lane.b32.xlu1 %v1309_v22, %s2576_s19  ;;  %v1310_v32 = vmul.f32 %v1309_v22, %v2928_v53 }
 0xf0e   :  { %v2527_v25 = vpop.eup %2526 }
 0xf0f   :  { %v1211_v26 = vsel %vm2672_vm5, %v2525_v24, %v2527_v25 }
 0xf10   :  { %1214 = vrot.lane.b32.xlu0 %v1211_v26, %s2576_s19  ;;  %v1212_v56 = vmul.f32 %v1211_v26, %v2932_v51 }
 0xf7e   :  { %v1313_v27 = vpop.permute.xlu1 %1312 }
 0xf7f   :  { %v1315_v28 = vmul.f32 %v1313_v27, %v1309_v22 }
 0xf81   :  { %1317 = vrot.lane.b32.xlu1 %v1315_v28, %s2577_s20 }
 0xf82   :  { %v1215_v29 = vpop.permute.xlu0 %1214 }
 0xf83   :  { %v1217_v30 = vmul.f32 %v1215_v29, %v1211_v26 }
 0xf85   :  { %1219 = vrot.lane.b32.xlu0 %v1217_v30, %s2577_s20 }
 0xff3   :  { %v1318_v33 = vpop.permute.xlu1 %1317 }
 0xff4   :  { %v2970_v34 = vadd.f32 %v1318_v33, %v1310_v32 }
 0xff6   :  { %2528 = vtanh.f32 %v2970_v34 }
 0xff7   :  { %v1220_v35 = vpop.permute.xlu0 %1219 }
 0xff8   :  { %v2974_v36 = vadd.f32 %v1220_v35, %v1212_v56 }
 0xffa   :  { %2530 = vtanh.f32 %v2974_v36 }
0x1000   :  { %v2529_v37 = vpop.eup %2528 }
0x1001   :  { %1323 = vrot.lane.b32.xlu1 %v2529_v37, %s2576_s19 }
0x1004   :  { %v2531_v39 = vpop.eup %2530 }
0x1005   :  { %1225 = vrot.lane.b32.xlu0 %v2531_v39, %s2576_s19 }
0x1073   :  { %v1324_v40 = vpop.permute.xlu1 %1323 }
0x1074   :  { %v1326_v31 = vmul.f32 %v1324_v40, %v1309_v22 }
0x1076   :  { %1328 = vrot.lane.b32.xlu0 %v1326_v31, %s2577_s20 }
0x1077   :  { %v1226_v42 = vpop.permute.xlu0 %1225 }
0x1078   :  { %v1228_v43 = vmul.f32 %v1226_v42, %v1211_v26 }
0x107a   :  { %1332 = vrot.lane.b32.xlu1 %v1228_v43, %s2576_s19 }
0x10e8   :  { %v1329_v44 = vpop.permute.xlu0 %1328 }
0x10e9   :  { %2243 = vmatmul.mubr.msk.f32.vlgmr.msra.gmra.mrb[20].mxu0 %vm205_vm6, %v1329_v44 }
0x10ea   :  { %2410 = vmatpush3.bf16.msra.mxu0 %v2702_v38  ;;  %2261 = vmatprep.mubr.msk.f32.mxu0 %vm2574_vm2, %v2575_v8 }
0x10eb   :  { %2411 = vmatprep.subr.bf16.mxu0 %v2573_v0 }
0x10ec   :  { %v1333_v45 = vpop.permute.xlu1 %1332 }
0x10ed   :  { %v1335_v47 = vsel %vm205_vm6, %v1329_v44, %v1333_v45 }
0x10ee   :  { %2232 = vmatmul.mubr.msk.f32.vlgmr.msra.gmra.mrb[10].mxu1 %vm310_vm7, %v1335_v47  ;;  %2413 = vmatpush3.bf16.msra.mxu0 %v2713_v41 }
0x10ef   :  { %2422 = vmatpush3.bf16.msra.mxu1 %v2634_v4  ;;  %2414 = vmatprep.subr.bf16.mxu0 %v2573_v0  ;;  %v192_v4 = vadd.f32 %v2669_v12, %v2769_v58 }
0x10f0   :  { %2423 = vmatprep.subr.bf16.mxu1 %v2573_v0  ;;  %2272 = vmatprep.mubr.msk.f32.mxu1 %vm2574_vm2, %v2575_v8 }
0x10f2   :  { %2416 = vmatpush3.bf16.msra.mxu0 %v2733_v46 }
0x10f3   :  { %2425 = vmatpush3.bf16.msra.mxu1 %v2655_v10  ;;  %2417 = vmatprep.subr.bf16.mxu0 %v2573_v0 }
0x10f4   :  { %2426 = vmatprep.subr.bf16.mxu1 %v2573_v0 }
0x10f6   :  { %2419 = vmatpush3.bf16.msra.mxu0 %v2749_v50 }
0x11bc   :  { %v1502_v53 = vpop.f32.mrb[20].mxu0 }
0x11bd   :  { %v1506_v48 = vadd.f32 %v1502_v53, %v192_v4  ;;  %v2244_v49 = vpop.f32.mrb[21].mxu0 }
0x11bf   :  { %v1910_v51 = vmul.f32 -1.442695, %v1506_v48 }
0x11c1   :  { %2532 = vpow2.f32 %v1910_v51  ;;  %v1405_v52 = vpop.f32.mrb[10].mxu1 }
0x11c2   :  { %v1406_v59 = vadd.f32 %v2789_v61, %v1405_v52  ;;  %v2233_v60 = vpop.f32.mrb[11].mxu1 }
0x11c4   :  { %v1908_v62 = vmul.f32 -1.442695, %v1406_v59 }
0x11c6   :  { %2534 = vpow2.f32 %v1908_v62 }
0x11c7   :  { %2536 = vtanh.f32 %v1506_v48 }
0x11cb   :  { %v2533_v10 = vpop.eup %2532 }
0x11cc   :  { %v1511_v63 = vadd.f32 1.0, %v2533_v10 }
0x11ce   :  { %2538 = vrcp.f32 %v1511_v63 }
0x11cf   :  { %2540 = vtanh.f32 %v1406_v59 }
0x11d0   :  { %v2535_v1 = vpop.eup %2534 }
0x11d1   :  { %v1413_v2 = vadd.f32 1.0, %v2535_v1  ;;  %v2537_v12 = vpop.eup %2536 }
0x11d3   :  { %2542 = vrcp.f32 %v1413_v2 }
0x11d8   :  { %v2539_v58 = vpop.eup %2538 }
0x11d9   :  { %v1514_v54 = vsel %vm2672_vm5, %v2537_v12, %v2539_v58  ;;  %v2541_v3 = vpop.eup %2540 }
0x11da   :  { %1517 = vrot.lane.b32.xlu1 %v1514_v54, %s2576_s19  ;;  %v1515_v15 = vmul.f32 %v1514_v54, %v2970_v34 }
0x11dd   :  { %v2543_v5 = vpop.eup %2542 }
0x11de   :  { %v1416_v6 = vsel %vm2672_vm5, %v2541_v3, %v2543_v5 }
0x11df   :  { %1419 = vrot.lane.b32.xlu0 %v1416_v6, %s2576_s19  ;;  %v1417_v18 = vmul.f32 %v1416_v6, %v2974_v36 }
0x124c   :  { %v1518_v7 = vpop.permute.xlu1 %1517 }
0x124d   :  { %v1520_v9 = vmul.f32 %v1518_v7, %v1514_v54 }
0x124f   :  { %1522 = vrot.lane.b32.xlu1 %v1520_v9, %s2577_s20 }
0x1251   :  { %v1420_v13 = vpop.permute.xlu0 %1419 }
0x1252   :  { %v1422_v14 = vmul.f32 %v1420_v13, %v1416_v6 }
0x1254   :  { %1424 = vrot.lane.b32.xlu0 %v1422_v14, %s2577_s20 }
0x12c1   :  { %v1523_v16 = vpop.permute.xlu1 %1522 }
0x12c2   :  { %v3011_v17 = vadd.f32 %v1523_v16, %v1515_v15 }
0x12c4   :  { %2544 = vtanh.f32 %v3011_v17 }
0x12c6   :  { %v1425_v19 = vpop.permute.xlu0 %1424 }
0x12c7   :  { %v3015_v11 = vadd.f32 %v1425_v19, %v1417_v18 }
0x12c9   :  { %2546 = vtanh.f32 %v3015_v11 }
0x12ce   :  { %v2545_v20 = vpop.eup %2544 }
0x12cf   :  { %1528 = vrot.lane.b32.xlu1 %v2545_v20, %s2576_s19 }
0x12d3   :  { %v2547_v55 = vpop.eup %2546 }
0x12d4   :  { %1430 = vrot.lane.b32.xlu0 %v2547_v55, %s2576_s19 }
0x1341   :  { %v1529_v21 = vpop.permute.xlu1 %1528 }
0x1342   :  { %v1531_v22 = vmul.f32 %v1529_v21, %v1514_v54 }
0x1344   :  { %1533 = vrot.lane.b32.xlu0 %v1531_v22, %s2577_s20 }
0x1346   :  { %v1431_v24 = vpop.permute.xlu0 %1430 }
0x1347   :  { %v1433_v25 = vmul.f32 %v1431_v24, %v1416_v6 }
0x1349   :  { %1537 = vrot.lane.b32.xlu1 %v1433_v25, %s2576_s19 }
0x13b6   :  { %v1534_v26 = vpop.permute.xlu0 %1533 }
0x13b7   :  { %2273 = vmatmul.mubr.msk.f32.vlgmr.msra.gmra.mrb[12].mxu1 %vm205_vm6, %v1534_v26 }
0x13b8   :  { %2428 = vmatpush3.bf16.msra.mxu1 %v2702_v38  ;;  %2291 = vmatprep.mubr.msk.f32.mxu1 %vm2574_vm2, %v2575_v8  ;;  %v2572_v8 = vld [vmem:[%s3075_s3] ss:$0 sm:$0xff] }
0x13b9   :  { %2429 = vmatprep.subr.bf16.mxu1 %v2573_v0  ;;  %v197_v38 = vadd.f32 %v2572_v8, %v2767_v57 }
0x13bb   :  { %v1538_v27 = vpop.permute.xlu1 %1537 }
0x13bc   :  { %v1540_v28 = vsel %vm205_vm6, %v1534_v26, %v1538_v27  ;;  %2431 = vmatpush3.bf16.msra.mxu1 %v2713_v41  ;;  %v1918_v27 = vld [vmem:[#allocation2] ss:$0 sm:$0xff] }
0x13bd   :  { %2262 = vmatmul.mubr.msk.f32.vlgmr.msra.gmra.mrb[22].mxu0 %vm310_vm7, %v1540_v28  ;;  %2432 = vmatprep.subr.bf16.mxu1 %v2573_v0 }
0x13c0   :  { %2434 = vmatpush3.bf16.msra.mxu1 %v2733_v46 }
0x13c1   :  { %2435 = vmatprep.subr.bf16.mxu1 %v2573_v0 }
0x13c4   :  { %2437 = vmatpush3.bf16.msra.mxu1 %v2749_v50 }
0x148a   :  { %v1707_v29 = vpop.f32.mrb[12].mxu1 }
0x148b   :  { %v1711_v30 = vadd.f32 %v1707_v29, %v197_v38  ;;  %v2274_v32 = vpop.f32.mrb[13].mxu1 }
0x148d   :  { %v1914_v41 = vmul.f32 -1.442695, %v1711_v30 }
0x148f   :  { %2548 = vpow2.f32 %v1914_v41 }
0x1490   :  { %v1610_v33 = vpop.f32.mrb[22].mxu0 }
0x1491   :  { %v1611_v34 = vadd.f32 %v2789_v61, %v1610_v33  ;;  %v2263_v56 = vpop.f32.mrb[23].mxu0 }
0x1493   :  { %v1912_v46 = vmul.f32 -1.442695, %v1611_v34 }
0x1495   :  { %2550 = vpow2.f32 %v1912_v46 }
0x1496   :  { %2552 = vtanh.f32 %v1711_v30 }
0x1499   :  { %v2549_v0 = vpop.eup %2548 }
0x149a   :  { %v1716_v35 = vadd.f32 1.0, %v2549_v0 }
0x149c   :  { %2554 = vrcp.f32 %v1716_v35 }
0x149d   :  { %2556 = vtanh.f32 %v1611_v34 }
0x149f   :  { %v2551_v50 = vpop.eup %2550 }
0x14a0   :  { %v1618_v36 = vadd.f32 1.0, %v2551_v50  ;;  %v2553_v57 = vpop.eup %2552 }
0x14a2   :  { %2558 = vrcp.f32 %v1618_v36 }
0x14a6   :  { %v2555_v37 = vpop.eup %2554 }
0x14a7   :  { %v1719_v39 = vsel %vm2672_vm5, %v2553_v57, %v2555_v37  ;;  %v2557_v40 = vpop.eup %2556 }
0x14a8   :  { %1722 = vrot.lane.b32.xlu1 %v1719_v39, %s2576_s19  ;;  %v1720_v4 = vmul.f32 %v1719_v39, %v3011_v17 }
0x14ac   :  { %v2559_v31 = vpop.eup %2558 }
0x14ad   :  { %v1621_v42 = vsel %vm2672_vm5, %v2557_v40, %v2559_v31 }
0x14ae   :  { %1624 = vrot.lane.b32.xlu0 %v1621_v42, %s2576_s19  ;;  %v1622_v49 = vmul.f32 %v1621_v42, %v3015_v11 }
0x151a   :  { %v1723_v43 = vpop.permute.xlu1 %1722 }
0x151b   :  { %v1725_v44 = vmul.f32 %v1723_v43, %v1719_v39 }
0x151d   :  { %1727 = vrot.lane.b32.xlu1 %v1725_v44, %s2577_s20 }
0x1520   :  { %v1625_v45 = vpop.permute.xlu0 %1624 }
0x1521   :  { %v1627_v47 = vmul.f32 %v1625_v45, %v1621_v42 }
0x1523   :  { %1629 = vrot.lane.b32.xlu0 %v1627_v47, %s2577_s20 }
0x158f   :  { %v1728_v53 = vpop.permute.xlu1 %1727 }
0x1590   :  { %v1730_v48 = vadd.f32 %v1728_v53, %v1720_v4 }
0x1592   :  { %2560 = vtanh.f32 %v1730_v48 }
0x1595   :  { %v1630_v51 = vpop.permute.xlu0 %1629 }
0x1596   :  { %v1632_v52 = vadd.f32 %v1630_v51, %v1622_v49 }
0x1598   :  { %2562 = vtanh.f32 %v1632_v52 }
0x159c   :  { %v2561_v59 = vpop.eup %2560 }
0x159d   :  { %1733 = vrot.lane.b32.xlu1 %v2561_v59, %s2576_s19 }
0x15a2   :  { %v2563_v60 = vpop.eup %2562 }
0x15a3   :  { %1635 = vrot.lane.b32.xlu0 %v2563_v60, %s2576_s19 }
0x160f   :  { %v1734_v62 = vpop.permute.xlu1 %1733 }
0x1610   :  { %v1736_v10 = vmul.f32 %v1734_v62, %v1719_v39 }
0x1612   :  { %1738 = vrot.lane.b32.xlu0 %v1736_v10, %s2577_s20 }
0x1615   :  { %v1636_v63 = vpop.permute.xlu0 %1635 }
0x1616   :  { %v1638_v1 = vmul.f32 %v1636_v63, %v1621_v42 }
0x1618   :  { %1742 = vrot.lane.b32.xlu1 %v1638_v1, %s2576_s19 }
0x1684   :  { %v1739_v2 = vpop.permute.xlu0 %1738 }
0x168a   :  { %v1743_v12 = vpop.permute.xlu1 %1742 }
0x168b   :  { %v1745_v58 = vsel %vm205_vm6, %v1739_v2, %v1743_v12 }
0x168c   :  { %2292 = vmatmul.mubr.msk.f32.vlgmr.msra.gmra.mrb[14].mxu1 %vm310_vm7, %v1745_v58 }
0x175f   :  { %v1815_v54 = vpop.f32.mrb[14].mxu1 }
0x1760   :  { %v1816_v3 = vadd.f32 %v2789_v61, %v1815_v54  ;;  %v2293_v5 = vpop.f32.mrb[15].mxu1  ;;  %v1917_v61 = vld [vmem:[%s3078_s6] ss:$0 sm:$0xff] }
0x1762   :  { %v1916_v6 = vmul.f32 -1.442695, %v1816_v3 }
0x1764   :  { %2564 = vpow2.f32 %v1916_v6 }
0x1765   :  { %2566 = vtanh.f32 %v1816_v3 }
0x176e   :  { %v2565_v7 = vpop.eup %2564 }
0x176f   :  { %v1823_v9 = vadd.f32 1.0, %v2565_v7  ;;  %v2567_v13 = vpop.eup %2566 }
0x1771   :  { %2568 = vrcp.f32 %v1823_v9 }
0x177b   :  { %v2569_v14 = vpop.eup %2568 }
0x177c   :  { %v1826_v15 = vsel %vm2672_vm5, %v2567_v13, %v2569_v14 }
0x177d   :  { %1829 = vrot.lane.b32.xlu0 %v1826_v15, %s2576_s19  ;;  %v1827_v18 = vmul.f32 %v1826_v15, %v1632_v52 }
0x17ef   :  { %v1830_v16 = vpop.permute.xlu0 %1829 }
0x17f0   :  { %v1832_v17 = vmul.f32 %v1830_v16, %v1826_v15 }
0x17f2   :  { %1834 = vrot.lane.b32.xlu1 %v1832_v17, %s2577_s20 }
0x17f6   :  { %1850 = vrot.lane.b32.xlu1 %v1917_v61, %s2578_s29 }
0x1864   :  { %v1835_v19 = vpop.permute.xlu1 %1834 }
0x1865   :  { %v1837_v11 = vadd.f32 %v1835_v19, %v1827_v18 }
0x1867   :  { %2570 = vtanh.f32 %v1837_v11 }
0x1868   :  { %v1851_v21 = vpop.permute.xlu1 %1850 }
0x1871   :  { %v2571_v20 = vpop.eup %2570 }
0x1872   :  { %1840 = vrot.lane.b32.xlu0 %v2571_v20, %s2576_s19 }
0x18e4   :  { %v1841_v55 = vpop.permute.xlu0 %1840 }
0x18e5   :  { %v1843_v22 = vmul.f32 %v1841_v55, %v1826_v15 }
0x18e7   :  { %v1853_v24 = vmul.f32 %v1851_v21, %v1843_v22 }
0x18e9   :  { %1855 = vrot.lane.b32.xlu0 %v1853_v24, %s2577_s20 }
0x195b   :  { %v1856_v25 = vpop.permute.xlu0 %1855 }
0x195c   :  { %v1858_v26 = vsel %vm205_vm6, %v1856_v25, 0.0 }
0x195d   :  { %1859 = vadd.xlane.f32.xlu1 %v1858_v26 }
0x19ea   :  { %v1860_v28 = vpop.xlane.xlu1 %1859 }
0x19eb   :  { %v1868_v8 = vadd.f32 %v1918_v27, %v1860_v28 }
0x19ed   :  { %1870 = vst.msk [vmem:[%s3080_s8] sm:$0xff] %vm1869_vm8, %v1868_v8 }

</bundles_post_ra>
